<compile_context>
chip_gen: v7x
topology: tpu7x:2x2x1
jax: 0.10.0
libtpu: 0.0.40
codegen_flags: <defaults>
</compile_context>

<pallas_src>
import jax
import jax.numpy as jnp
from jax import lax
from jax.experimental import pallas as pl
from jax.experimental.pallas import tpu as pltpu

FEAT_DIM = 2048            # backbone descriptor dim (ResNet_RMAC)
CODE_DIM = 1024            # encoder output / code dim
GEM_P = 3.0                # GeM pooling power
GEM_EPS = 1e-6
L2_EPS = 1e-12             # F.normalize eps
FD_CHUNK = 512             # FEAT_DIM processed in 4 chunks of 512
N_FD_CHUNKS = FEAT_DIM // FD_CHUNK


def _round_up(x, m):
    return -(-x // m) * m


# ----------------------------------------------------------------------------
# Kernel 1: backbone-stub projection + GeM (sum of cubes) reduction over space
# ----------------------------------------------------------------------------
def _make_gem_kernel(inv_s):
    """Builds the reduction kernel with 1/S folded in as a trace-time constant."""

    def kernel(img_ref, wproj_ref, out_ref, acc_ref):
        # img_ref   : (1, tile_s, C)   bf16 channels-last image tile (streamed)
        # wproj_ref : (C, 2048)        bf16 backbone-stub 1x1 projection (VMEM-resident, 16 KiB)
        # out_ref   : (1, 1, 2048)     f32 GeM feature row (written at the last k step)
        # acc_ref   : (1, 2048)        f32 running sum of f^3 (persists across k)
        k = pl.program_id(1)

        @pl.when(k == 0)
        def _init():
            acc_ref[...] = jnp.zeros_like(acc_ref)

        x = img_ref[0]                                        # (tile_s, C) bf16

        # FEAT_DIM-chunked projection: each (tile_s, 512) matmul result is clamped,
        # cubed and row-summed immediately, so the full (tile_s, 2048) f32 temporary
        # never materializes in VMEM.
        def chunk_body(c, carry):
            off = pl.multiple_of(c * FD_CHUNK, FD_CHUNK)
            w = wproj_ref[:, pl.ds(off, FD_CHUNK)]            # (C, 512) bf16
            f = jnp.dot(x, w, preferred_element_type=jnp.float32)   # (tile_s, 512) f32 (MXU)
            f = jnp.maximum(f, GEM_EPS)
            acc_ref[:, pl.ds(off, FD_CHUNK)] += jnp.sum(f * f * f, axis=0, keepdims=True)
            return carry

        lax.fori_loop(0, N_FD_CHUNKS, chunk_body, None, unroll=True)

        @pl.when(k == pl.num_programs(1) - 1)
        def _finalize():
            # GeM: mean(f^p) ** (1/p); 1/S folded in here (EUP exp/log).
            m = acc_ref[...] * inv_s                          # (1, 2048), >= eps^3 > 0
            out_ref[0] = jnp.exp(jnp.log(m) * (1.0 / GEM_P))

    return kernel


# ----------------------------------------------------------------------------
# Kernel 2: encoder matmul + sigmoid-0.5 + 8-bit quantization + L2 normalize
# ----------------------------------------------------------------------------
def _head_kernel(feat_ref, wenc_ref, benc_ref, out_ref):
    # feat_ref : (tile_n, 2048) f32 GeM features (batched -> full MXU sublane use)
    # wenc_ref : (2048, 1024)   f32 encoder weight (f32 for parity with PyTorch)
    # benc_ref : (1, 1024)      f32 encoder bias
    # out_ref  : (tile_n, 1024) f32 l2-normalized quantized descriptors (lane-dense)
    y = jnp.dot(feat_ref[...], wenc_ref[...],
                preferred_element_type=jnp.float32) + benc_ref[...]
    # sigmoid(y) - 0.5 == 0.5 * tanh(y / 2)  (numerically stable, EUP op)
    y = 0.5 * jnp.tanh(0.5 * y)
    # DSQ quantization stub: uniform 8-bit over [-0.5, 0.5]
    u = jnp.clip(jnp.round((y + 0.5) * 255.0), 0.0, 255.0)
    yq = u * (1.0 / 255.0) - 0.5
    # F.normalize: x / max(||x||_2, eps), via rsqrt on the EUP
    sumsq = jnp.sum(yq * yq, axis=-1, keepdims=True)
    inv_n = lax.rsqrt(jnp.maximum(sumsq, L2_EPS * L2_EPS))
    out_ref[...] = yq * inv_n


# ----------------------------------------------------------------------------
# Wrappers
# ----------------------------------------------------------------------------
def _spatial_tiling(S, max_tile=1024):
    """Pick (tile_s, padded_S). Prefers multiple-of-8 divisors of S; pads otherwise."""
    max_tile = max(8, max_tile - max_tile % 8)
    if S <= max_tile:
        t = _round_up(S, 8)
        return t, t
    best = None
    for t in range(8, max_tile + 1, 8):
        if S % t == 0:
            best = t
    if best is not None:
        return best, S
    return max_tile, _round_up(S, max_tile)


def gem_features(img_nsc_bf16, wproj, *, true_s, tile_s=None, max_tile=1024,
                 core_parallel_batch=False, vmem_limit_bytes=32 * 1024 * 1024):
    """img_nsc_bf16: (N, S, C) bf16 channels-last image. Returns (N, 2048) f32 GeM features."""
    N, S, C = img_nsc_bf16.shape
    if tile_s is None:
        tile_s, s_pad = _spatial_tiling(S, max_tile)
    else:
        tile_s = _round_up(tile_s, 8)
        s_pad = _round_up(S, tile_s)
    if s_pad != S:
        # zero rows -> max(0, eps)^3 ~= 1e-18 per element in the sum: negligible.
        img_nsc_bf16 = jnp.pad(img_nsc_bf16, ((0, 0), (0, s_pad - S), (0, 0)))
    num_k = s_pad // tile_s

    if core_parallel_batch:
        dim_sem = (pltpu.CORE_PARALLEL, pltpu.ARBITRARY)   # v7x: use both TensorCores
    else:
        dim_sem = ("parallel", "arbitrary")

    grid_spec = pltpu.PrefetchScalarGridSpec(
        num_scalar_prefetch=0,
        grid=(N, num_k),
        in_specs=[
            # image: streamed per (batch, spatial-tile)
            pl.BlockSpec((1, tile_s, C), lambda n, k: (n, k, 0)),
            # projection weight: VMEM-resident (constant block index, 16 KiB)
            pl.BlockSpec((C, FEAT_DIM), lambda n, k: (0, 0)),
        ],
        # output row stays resident across the reduction axis k
        out_specs=pl.BlockSpec((1, 1, FEAT_DIM), lambda n, k: (n, 0, 0)),
        scratch_shapes=[pltpu.VMEM((1, FEAT_DIM), jnp.float32)],
    )

    feat = pl.pallas_call(
        _make_gem_kernel(1.0 / float(true_s)),
        out_shape=jax.ShapeDtypeStruct((N, 1, FEAT_DIM), jnp.float32),
        grid_spec=grid_spec,
        compiler_params=pltpu.CompilerParams(
            dimension_semantics=dim_sem,
            vmem_limit_bytes=vmem_limit_bytes,
        ),
    )(img_nsc_bf16, wproj.astype(jnp.bfloat16))
    return feat.reshape(N, FEAT_DIM)


def encode_head(feat, wenc, benc, *, tile_n=None, vmem_limit_bytes=32 * 1024 * 1024):
    """feat: (N, 2048) f32. Returns (N, 1024) f32 normalized quantized descriptors."""
    N = feat.shape[0]
    if tile_n is None:
        tile_n = N if N <= 256 else 256
    n_pad = _round_up(N, tile_n)
    if n_pad != N:
        feat = jnp.pad(feat, ((0, n_pad - N), (0, 0)))

    grid_spec = pltpu.PrefetchScalarGridSpec(
        num_scalar_prefetch=0,
        grid=(n_pad // tile_n,),
        in_specs=[
            pl.BlockSpec((tile_n, FEAT_DIM), lambda i: (i, 0)),
            pl.BlockSpec((FEAT_DIM, CODE_DIM), lambda i: (0, 0)),
            pl.BlockSpec((1, CODE_DIM), lambda i: (0, 0)),
        ],
        out_specs=pl.BlockSpec((tile_n, CODE_DIM), lambda i: (i, 0)),
    )

    out = pl.pallas_call(
        _head_kernel,
        out_shape=jax.ShapeDtypeStruct((n_pad, CODE_DIM), jnp.float32),
        grid_spec=grid_spec,
        compiler_params=pltpu.CompilerParams(
            dimension_semantics=("parallel",),
            vmem_limit_bytes=vmem_limit_bytes,
        ),
    )(feat.astype(jnp.float32),
      wenc.astype(jnp.float32),
      benc.reshape(1, CODE_DIM).astype(jnp.float32))
    return out[:N]


def resquantgem_forward(img_nchw, wproj, wenc, benc, *, tile_s=None,
                        core_parallel_batch=False):
    """img_nchw: (N, C, H, W) f32 (PyTorch layout). Returns ((N, 1024) f32, None)."""
    N, C, H, W = img_nchw.shape
    S = H * W
    # TODO(synk): produce channels-last bf16 upstream to avoid this extra XLA HBM pass.
    img_nsc = jnp.transpose(img_nchw, (0, 2, 3, 1)).reshape(N, S, C).astype(jnp.bfloat16)
    feat = gem_features(img_nsc, wproj, true_s=S, tile_s=tile_s,
                        core_parallel_batch=core_parallel_batch)
    out = encode_head(feat, wenc, benc)
    return out, None


# ----------------------------------------------------------------------------
# Reference + demo
# ----------------------------------------------------------------------------
def init_params(key, C):
    """Deterministic parameter init (synthetic; no checkpoint load)."""
    k1, k2, k3 = jax.random.split(key, 3)
    wproj = jax.random.normal(k1, (C, FEAT_DIM), jnp.float32) * 0.05
    wenc = jax.random.normal(k2, (FEAT_DIM, CODE_DIM), jnp.float32) * (1.0 / FEAT_DIM ** 0.5)
    benc = jax.random.normal(k3, (CODE_DIM,), jnp.float32) * 0.01
    return wproj, wenc, benc


def reference_forward(img_nchw, wproj, wenc, benc):
    """Pure-JAX reference of the same forward (same stub semantics)."""
    N, C, H, W = img_nchw.shape
    S = H * W
    x = jnp.transpose(img_nchw, (0, 2, 3, 1)).reshape(N, S, C).astype(jnp.bfloat16)
    f = jnp.einsum("nsc,cf->nsf", x, wproj.astype(jnp.bfloat16),
                   preferred_element_type=jnp.float32)
    f = jnp.maximum(f, GEM_EPS)
    feat = jnp.mean(f ** GEM_P, axis=1) ** (1.0 / GEM_P)
    y = feat @ wenc + benc
    y = jax.nn.sigmoid(y) - 0.5
    u = jnp.clip(jnp.round((y + 0.5) * 255.0), 0.0, 255.0)
    yq = u / 255.0 - 0.5
    norm = jnp.maximum(jnp.linalg.norm(yq, axis=-1, keepdims=True), L2_EPS)
    return yq / norm


if __name__ == "__main__":
    key = jax.random.PRNGKey(0)
    k_img, k_par = jax.random.split(key)

    N, C, H, W = 2, 4, 16, 16
    img = jax.random.normal(k_img, (N, C, H, W), jnp.float32)
    wproj, wenc, benc = init_params(k_par, C)

    # tile_s=64 -> 4 reduction steps over S=256 (exercises the accumulate/finalize
    # path); the default auto-tiling would pick a single 256-row tile.
    y_rec_f, second = resquantgem_forward(img, wproj, wenc, benc, tile_s=64)
    y_rec_f = jax.block_until_ready(y_rec_f)

    assert y_rec_f.shape == (N, CODE_DIM)
    assert y_rec_f.dtype == jnp.float32
    assert second is None

    # sanity: rows unit-norm, and agreement with the pure-JAX reference
    norms = jnp.linalg.norm(y_rec_f, axis=-1)
    assert bool(jnp.all(jnp.abs(norms - 1.0) < 1e-4))
    y_ref = reference_forward(img, wproj, wenc, benc)
    assert bool(jnp.all(jnp.abs(y_rec_f - y_ref) < 1e-2))

    print("KERNEL_OK")
</pallas_src>

<mosaic_0001>
module attributes {stable_mosaic.version = 11 : i64} {
  func.func @kernel(%arg0: i32, %arg1: i32, %arg2: memref<1x64x4xbf16, #tpu.memory_space<vmem>>, %arg3: memref<4x2048xbf16, #tpu.memory_space<vmem>>, %arg4: memref<1x1x2048xf32, #tpu.memory_space<vmem>>, %arg5: memref<1x2048xf32, #tpu.memory_space<vmem>>) attributes {dimension_semantics = [#tpu.dimension_semantics<parallel>, #tpu.dimension_semantics<arbitrary>], iteration_bounds = array<i64: 2, 4>, scalar_prefetch = 0 : i64, scratch_operands = 1 : i64, tpu.core_type = #tpu.core_type<tc>, window_params = [{transform_indices = @transform_0, window_bounds = array<i64: 1, 64, 4>}, {pipeline_mode = #tpu.pipeline_mode<synchronous>, transform_indices = @transform_1, window_bounds = array<i64: 4, 2048>}, {transform_indices = @transform_2, window_bounds = array<i64: 1, 1, 2048>}]} {
    %c0_i32 = arith.constant 0 : i32
    %0 = arith.cmpi eq, %arg1, %c0_i32 : i32
    %1 = arith.extui %0 : i1 to i32
    %c0_i32_0 = arith.constant 0 : i32
    %2 = arith.cmpi ne, %1, %c0_i32_0 : i32
    scf.if %2 {
      %cst_32 = arith.constant 0.000000e+00 : f32
      %72 = vector.broadcast %cst_32 : f32 to vector<1x2048xf32>
      %c0_33 = arith.constant 0 : index
      %c0_34 = arith.constant 0 : index
      %73 = vector.load %arg5[%c0_33, %c0_34] : memref<1x2048xf32, #tpu.memory_space<vmem>>, vector<1x2048xf32>
      tpu.vector_store %arg5[%c0_33, %c0_34], %72 {strides = array<i32>} : memref<1x2048xf32, #tpu.memory_space<vmem>>, vector<1x2048xf32>,
    } else {
    }
    %c0 = arith.constant 0 : index
    %c0_1 = arith.constant 0 : index
    %c0_2 = arith.constant 0 : index
    %3 = vector.load %arg2[%c0, %c0_1, %c0_2] : memref<1x64x4xbf16, #tpu.memory_space<vmem>>, vector<1x64x4xbf16>
    %4 = vector.shape_cast %3 : vector<1x64x4xbf16> to vector<64x4xbf16>
    %c0_i32_3 = arith.constant 0 : i32
    %c512_i32 = arith.constant 512 : i32
    %5 = arith.muli %c0_i32_3, %c512_i32 : i32
    %6 = tpu.assume_multiple %5, 512 : i32
    %c0_4 = arith.constant 0 : index
    %7 = arith.index_cast %6 : i32 to index
    %8 = vector.load %arg3[%c0_4, %7] : memref<4x2048xbf16, #tpu.memory_space<vmem>>, vector<4x512xbf16>
    %cst = arith.constant dense<0.000000e+00> : vector<64x512xf32>
    %9 = tpu.matmul %4, %8, %cst {dimension_numbers = #tpu.dot_dimension_numbers<[1], [0], [0], [1], [0, 0, 1, 1], [], []>} : vector<64x4xbf16>, vector<4x512xbf16>, vector<64x512xf32> -> vector<64x512xf32>
    %cst_5 = arith.constant 9.99999997E-7 : f32
    %10 = vector.broadcast %cst_5 : f32 to vector<64x512xf32>
    %11 = arith.maximumf %9, %10 : vector<64x512xf32>
    %c0_6 = arith.constant 0 : index
    %12 = arith.index_cast %6 : i32 to index
    %13 = vector.load %arg5[%c0_6, %12] : memref<1x2048xf32, #tpu.memory_space<vmem>>, vector<1x512xf32>
    %14 = arith.mulf %11, %11 : vector<64x512xf32>
    %15 = arith.mulf %14, %11 : vector<64x512xf32>
    %cst_7 = arith.constant dense<0.000000e+00> : vector<512xf32>
    %16 = vector.multi_reduction <add>, %15, %cst_7 [0] : vector<64x512xf32> to vector<512xf32>
    %17 = vector.shape_cast %16 : vector<512xf32> to vector<1x512xf32>
    %18 = arith.addf %13, %17 : vector<1x512xf32>
    %c0_8 = arith.constant 0 : index
    %19 = arith.index_cast %6 : i32 to index
    %20 = vector.load %arg5[%c0_8, %19] : memref<1x2048xf32, #tpu.memory_space<vmem>>, vector<1x512xf32>
    tpu.vector_store %arg5[%c0_8, %19], %18 {strides = array<i32>} : memref<1x2048xf32, #tpu.memory_space<vmem>>, vector<1x512xf32>,
    %c1_i32 = arith.constant 1 : i32
    %c512_i32_9 = arith.constant 512 : i32
    %21 = arith.muli %c1_i32, %c512_i32_9 : i32
    %22 = tpu.assume_multiple %21, 512 : i32
    %c0_10 = arith.constant 0 : index
    %23 = arith.index_cast %22 : i32 to index
    %24 = vector.load %arg3[%c0_10, %23] : memref<4x2048xbf16, #tpu.memory_space<vmem>>, vector<4x512xbf16>
    %cst_11 = arith.constant dense<0.000000e+00> : vector<64x512xf32>
    %25 = tpu.matmul %4, %24, %cst_11 {dimension_numbers = #tpu.dot_dimension_numbers<[1], [0], [0], [1], [0, 0, 1, 1], [], []>} : vector<64x4xbf16>, vector<4x512xbf16>, vector<64x512xf32> -> vector<64x512xf32>
    %cst_12 = arith.constant 9.99999997E-7 : f32
    %26 = vector.broadcast %cst_12 : f32 to vector<64x512xf32>
    %27 = arith.maximumf %25, %26 : vector<64x512xf32>
    %c0_13 = arith.constant 0 : index
    %28 = arith.index_cast %22 : i32 to index
    %29 = vector.load %arg5[%c0_13, %28] : memref<1x2048xf32, #tpu.memory_space<vmem>>, vector<1x512xf32>
    %30 = arith.mulf %27, %27 : vector<64x512xf32>
    %31 = arith.mulf %30, %27 : vector<64x512xf32>
    %cst_14 = arith.constant dense<0.000000e+00> : vector<512xf32>
    %32 = vector.multi_reduction <add>, %31, %cst_14 [0] : vector<64x512xf32> to vector<512xf32>
    %33 = vector.shape_cast %32 : vector<512xf32> to vector<1x512xf32>
    %34 = arith.addf %29, %33 : vector<1x512xf32>
    %c0_15 = arith.constant 0 : index
    %35 = arith.index_cast %22 : i32 to index
    %36 = vector.load %arg5[%c0_15, %35] : memref<1x2048xf32, #tpu.memory_space<vmem>>, vector<1x512xf32>
    tpu.vector_store %arg5[%c0_15, %35], %34 {strides = array<i32>} : memref<1x2048xf32, #tpu.memory_space<vmem>>, vector<1x512xf32>,
    %c2_i32 = arith.constant 2 : i32
    %c512_i32_16 = arith.constant 512 : i32
    %37 = arith.muli %c2_i32, %c512_i32_16 : i32
    %38 = tpu.assume_multiple %37, 512 : i32
    %c0_17 = arith.constant 0 : index
    %39 = arith.index_cast %38 : i32 to index
    %40 = vector.load %arg3[%c0_17, %39] : memref<4x2048xbf16, #tpu.memory_space<vmem>>, vector<4x512xbf16>
    %cst_18 = arith.constant dense<0.000000e+00> : vector<64x512xf32>
    %41 = tpu.matmul %4, %40, %cst_18 {dimension_numbers = #tpu.dot_dimension_numbers<[1], [0], [0], [1], [0, 0, 1, 1], [], []>} : vector<64x4xbf16>, vector<4x512xbf16>, vector<64x512xf32> -> vector<64x512xf32>
    %cst_19 = arith.constant 9.99999997E-7 : f32
    %42 = vector.broadcast %cst_19 : f32 to vector<64x512xf32>
    %43 = arith.maximumf %41, %42 : vector<64x512xf32>
    %c0_20 = arith.constant 0 : index
    %44 = arith.index_cast %38 : i32 to index
    %45 = vector.load %arg5[%c0_20, %44] : memref<1x2048xf32, #tpu.memory_space<vmem>>, vector<1x512xf32>
    %46 = arith.mulf %43, %43 : vector<64x512xf32>
    %47 = arith.mulf %46, %43 : vector<64x512xf32>
    %cst_21 = arith.constant dense<0.000000e+00> : vector<512xf32>
    %48 = vector.multi_reduction <add>, %47, %cst_21 [0] : vector<64x512xf32> to vector<512xf32>
    %49 = vector.shape_cast %48 : vector<512xf32> to vector<1x512xf32>
    %50 = arith.addf %45, %49 : vector<1x512xf32>
    %c0_22 = arith.constant 0 : index
    %51 = arith.index_cast %38 : i32 to index
    %52 = vector.load %arg5[%c0_22, %51] : memref<1x2048xf32, #tpu.memory_space<vmem>>, vector<1x512xf32>
    tpu.vector_store %arg5[%c0_22, %51], %50 {strides = array<i32>} : memref<1x2048xf32, #tpu.memory_space<vmem>>, vector<1x512xf32>,
    %c3_i32 = arith.constant 3 : i32
    %c512_i32_23 = arith.constant 512 : i32
    %53 = arith.muli %c3_i32, %c512_i32_23 : i32
    %54 = tpu.assume_multiple %53, 512 : i32
    %c0_24 = arith.constant 0 : index
    %55 = arith.index_cast %54 : i32 to index
    %56 = vector.load %arg3[%c0_24, %55] : memref<4x2048xbf16, #tpu.memory_space<vmem>>, vector<4x512xbf16>
    %cst_25 = arith.constant dense<0.000000e+00> : vector<64x512xf32>
    %57 = tpu.matmul %4, %56, %cst_25 {dimension_numbers = #tpu.dot_dimension_numbers<[1], [0], [0], [1], [0, 0, 1, 1], [], []>} : vector<64x4xbf16>, vector<4x512xbf16>, vector<64x512xf32> -> vector<64x512xf32>
    %cst_26 = arith.constant 9.99999997E-7 : f32
    %58 = vector.broadcast %cst_26 : f32 to vector<64x512xf32>
    %59 = arith.maximumf %57, %58 : vector<64x512xf32>
    %c0_27 = arith.constant 0 : index
    %60 = arith.index_cast %54 : i32 to index
    %61 = vector.load %arg5[%c0_27, %60] : memref<1x2048xf32, #tpu.memory_space<vmem>>, vector<1x512xf32>
    %62 = arith.mulf %59, %59 : vector<64x512xf32>
    %63 = arith.mulf %62, %59 : vector<64x512xf32>
    %cst_28 = arith.constant dense<0.000000e+00> : vector<512xf32>
    %64 = vector.multi_reduction <add>, %63, %cst_28 [0] : vector<64x512xf32> to vector<512xf32>
    %65 = vector.shape_cast %64 : vector<512xf32> to vector<1x512xf32>
    %66 = arith.addf %61, %65 : vector<1x512xf32>
    %c0_29 = arith.constant 0 : index
    %67 = arith.index_cast %54 : i32 to index
    %68 = vector.load %arg5[%c0_29, %67] : memref<1x2048xf32, #tpu.memory_space<vmem>>, vector<1x512xf32>
    tpu.vector_store %arg5[%c0_29, %67], %66 {strides = array<i32>} : memref<1x2048xf32, #tpu.memory_space<vmem>>, vector<1x512xf32>,
    %c4_i32 = arith.constant 4 : i32
    %c3_i32_30 = arith.constant 3 : i32
    %69 = arith.cmpi eq, %arg1, %c3_i32_30 : i32
    %70 = arith.extui %69 : i1 to i32
    %c0_i32_31 = arith.constant 0 : i32
    %71 = arith.cmpi ne, %70, %c0_i32_31 : i32
    scf.if %71 {
      %c0_32 = arith.constant 0 : index
      %c0_33 = arith.constant 0 : index
      %72 = vector.load %arg5[%c0_32, %c0_33] : memref<1x2048xf32, #tpu.memory_space<vmem>>, vector<1x2048xf32>
      %cst_34 = arith.constant 3.906250e-03 : f32
      %73 = vector.broadcast %cst_34 : f32 to vector<1x2048xf32>
      %74 = arith.mulf %72, %73 : vector<1x2048xf32>
      %75 = math.log %74 : vector<1x2048xf32>
      %cst_35 = arith.constant 0.333333343 : f32
      %76 = vector.broadcast %cst_35 : f32 to vector<1x2048xf32>
      %77 = arith.mulf %75, %76 : vector<1x2048xf32>
      %78 = math.exp %77 : vector<1x2048xf32>
      %c0_36 = arith.constant 0 : index
      %c0_37 = arith.constant 0 : index
      %c0_38 = arith.constant 0 : index
      %79 = vector.load %arg4[%c0_36, %c0_37, %c0_38] : memref<1x1x2048xf32, #tpu.memory_space<vmem>>, vector<1x1x2048xf32>
      %80 = vector.shape_cast %79 : vector<1x1x2048xf32> to vector<1x2048xf32>
      %81 = vector.shape_cast %78 : vector<1x2048xf32> to vector<1x1x2048xf32>
      tpu.vector_store %arg4[%c0_36, %c0_37, %c0_38], %81 {strides = array<i32>} : memref<1x1x2048xf32, #tpu.memory_space<vmem>>, vector<1x1x2048xf32>,
    } else {
    }
    return
  }
  func.func @transform_0(%arg0: i32, %arg1: i32) -> (i32, i32, i32) {
    %c0_i32 = arith.constant 0 : i32
    %c0_i32_0 = arith.constant 0 : i32
    return %arg0, %arg1, %c0_i32 : i32, i32, i32
  }
  func.func @transform_1(%arg0: i32, %arg1: i32) -> (i32, i32) {
    %c0_i32 = arith.constant 0 : i32
    %c0_i32_0 = arith.constant 0 : i32
    %c0_i32_1 = arith.constant 0 : i32
    return %c0_i32, %c0_i32_0 : i32, i32
  }
  func.func @transform_2(%arg0: i32, %arg1: i32) -> (i32, i32, i32) {
    %c0_i32 = arith.constant 0 : i32
    %c0_i32_0 = arith.constant 0 : i32
    %c0_i32_1 = arith.constant 0 : i32
    return %arg0, %c0_i32, %c0_i32_0 : i32, i32, i32
  }
}

</mosaic_0001>

<bundles_post_ra>
// kernel: tpu_custom_call.1
= control target key start
LH: loop header
LB: loop body
LE: loop exit
PB: predicated region body
PF: predicated region fallthrough
CT: control target
= control target key end

     0   :  { %7 = vsyncpa [#allocation4], 0  ;;  %s2503_s0 = inlined_call_operand.vmem [shape: bf16[2,256,4], index: 0, kind: input, shape index: {}]   ;;  %s2504_s1 = inlined_call_operand.vmem [shape: bf16[4,2048], index: 1, kind: input, shape index: {}]   ;;  %s2505_s2 = inlined_call_operand.hbm [shape: f32[2,1,2048], index: 2, kind: output, shape index: {}]  }
   0x1   :  { %9 = vsyncpa [#allocation4 + $0x1], 0  ;;  %s2039_s9 = smov 0   ;;  %s2041_s10 = smov 0  }
   0x2   :  { %s2043_s11 = smov 0   ;;  %s2045_s12 = smov 0  }
   0x3   :  { %s2047_s13 = smov 0   ;;  %s2049_s14 = smov 0  }
   0x4   :  { %s2051_s15 = smov 0   ;;  %s2053_s16 = smov 0  }
   0x5 LB: > { %s1768_s17 = sadd.s32 4294967295, %s2017_s16   ;;  %s1769_s18 = sadd.s32 4294967294, %s2017_s16   ;;  %s2017_s16 = sphi %s2053_s16, %s15_s16   ;;  %s2013_s15 = sphi %s2051_s15, %s2516_s15   ;;  %s2009_s14 = sphi %s2049_s14, %s2515_s14   ;;  %s2005_s13 = sphi %s2047_s13, %s2514_s13   ;;  %s2001_s12 = sphi %s2045_s12, %s2513_s12   ;;  %s1997_s11 = sphi %s2043_s11, %s2512_s11   ;;  %s1993_s10 = sphi %s2041_s10, %s2511_s10   ;;  %s1989_s9 = sphi %s2039_s9, %s2510_s9  }
   0x6   : > { %s24_s19 = sadd.s32 1, %s2009_s14  ;;  %s27_s20 = sadd.s32 1, %s2013_s15 }
   0x7   : > { %p25_p0 = scmp.ge.s32.totalorder %s24_s19, 4  ;;  %p93_p1 = scmp.ne.s32.totalorder %s1997_s11, %s1993_s10 }
   0x8   : > { %p94_p2 = scmp.eq.s32.totalorder %s1768_s17, 7  ;;  %p99_p4 = scmp.ne.s32.totalorder %s1993_s10, %s1989_s9 }
   0x9   : > { %s2518_s19 = smov (%p25_p0, %s24_s19), 0  ;;  %s2520_s20 = smov (!%p25_p0, %s27_s20), %s2013_s15 }
   0xa   : > { %p2088_p3 = por %p94_p2, %p93_p1  ;;  %p29_p5 = scmp.ge.s32.totalorder %s2520_s20, 2 }
   0xb   : > { %p100_p6 = scmp.eq.s32.totalorder %s1769_s18, 7  ;;  %p1772_p7 = scmp.ge.s32.totalorder %s2017_s16, 1 }
   0xc   : > { %p134_p8 = scmp.lt.s32.totalorder %s2017_s16, 9  ;;  %s2522_s20 = smov (%p29_p5, %s2520_s20), 0 }
   0xd   : > { %p2098_p9 = por %p100_p6, %p99_p4  ;;  %s80_s23 = ssub.s32 %s2013_s15, %s2522_s20 }
   0xe   : > { %p135_p10 = pnand %p1772_p7, %p134_p8  ;;  %s83_s24 = sadd.s32 1, %s1997_s11 }
   0xf   : > { %p81_p11 = scmp.eq.s32.totalorder %s80_s23, 0  ;;  %s157_s26 = sand.u32 (!%p135_p10), 1, %s1993_s10  }
  0x10   : > { %138 = sbr.rel (%p135_p10) target bundleno = 497 (0x1f1), region = 28  ;;  %s1774_s27 = sshll.u32 (!%p135_p10), %s2001_s12, 3 }
  0x11   : > { %s2106_s25 = scalar_select %p81_p11, %s1997_s11, %s83_s24  }
  0x12   : > { %s1773_s28 = sshll.u32 (!%p135_p10), %s157_s26, 4  ;;  %p161_p12 = scmp.lt.s32.totalorder (!%p135_p10), %s2005_s13, 1 }
  0x13   : > { %p163_p13 = scmp.lt.s32.totalorder (!%p135_p10), %s1774_s27, 31  ;;  %s2119_s8 = scalar_lea.vmem (!%p135_p10), [#allocation3], %s1773_s28 }
  0x14   : > { %p1777_p0 = scmp.ne.s32.totalorder (!%p135_p10), %s2001_s12, 0 }
  0x17   : > { %s162_s29 = scalar_select %p161_p12, %s2005_s13, 1 }
  0x18   : > { %s2524_s27 = smov (!%p163_p13, %s1774_s27), 31  ;;  %174 = sbr.rel (%p1777_p0) target bundleno = 31 (0x1f), region = 32 }
  0x19   : > { %s1775_s30 = sshll.u32 %s162_s29, 5  ;;  %v2019_v0 = vmov (!%p1777_p0), 0.0  }
  0x1a   : > { %s166_s3 = sadd.s32 %s1775_s30, %s2524_s27  ;;  %175 = vst [vmem:[#allocation2] sm:$0xff] (!%p1777_p0), %v2019_v0  ;;  %176 = vst [vmem:[#allocation2 + $0x8] sm:$0xff] (!%p1777_p0), %v2019_v0 }
  0x1b   : > { %s1776_s4 = sshll.u32 %s166_s3, 2 }
  0x1c   : > { %s2117_s7 = scalar_lea.vmem %s2503_s0, %s1776_s4 }
  0x1f PF: > { %v185_v1 = vld [vmem:[%s2504_s1] sm:$0xff]  ;;  %v211_v2 = vlaneseq  ;;  %v2020_v3 = vmov 1983009808   ;;  %v2021_v6 = vmov 0   ;;  %v1792_v7 = vld [vmem:[%s2504_s1 + $0x8] sm:$0xff]  ;;  %v1803_v12 = vld [vmem:[%s2504_s1 + $0x10] sm:$0xff] }
  0x20   : > { %v209_v4 = vunpack.c.l.s4 %v2020_v3  ;;  %282 = vmatprep.mubr.bf16.mxu0 %v2021_v6  ;;  %355 = vmatprep.mubr.bf16.mxu1 %v2021_v6  ;;  %v207_v9 = vcombine.high %v185_v1, %v185_v1  ;;  %v583_v10 = vcombine.high %v1792_v7, %v1792_v7  ;;  %vm237_vm0 = vcmask 1041408   ;;  %v2142_v26 = vld [vmem:[%s2117_s7] sm:$0xff]   ;;  %v2157_v31 = vld [vmem:[%s2117_s7 + $0x8] sm:$0xff]   ;;  %v2166_v32 = vld [vmem:[%s2117_s7 + $0x10] sm:$0xff]   ;;  %p1825_p1 = scmp.ne.s32.totalorder %s2001_s12, 3 }
  0x21   : > { %v2126_v5 = vshrl.u32 %v211_v2, 7  ;;  %v942_v13 = vcombine.high %v1803_v12, %v1803_v12  ;;  %vm224_vm1 = vcmask 31744   ;;  %v2175_v33 = vld [vmem:[%s2117_s7 + $0x18] sm:$0xff]   ;;  %v2022_v44 = vmov 1966171168  }
  0x22   : > { %v210_v8 = vunpack.c.0.s8 %v209_v4  ;;  %v1814_v34 = vld [vmem:[%s2504_s1 + $0x18] sm:$0xff]  ;;  %v552_v45 = vunpack.c.l.s4 %v2022_v44  ;;  %vm2266_vm2 = vcmp.lt.s32.totalorder %v211_v2, 512 }
  0x23   : > { %v1301_v35 = vcombine.high %v1814_v34, %v1814_v34 }
  0x24   : > { %v213_v11 = vsub.s32 %v210_v8, %v2126_v5  ;;  %v553_v52 = vunpack.c.0.s8 %v552_v45 }
  0x26   : > { %v214_v14 = vrot.slane %v185_v1, %v213_v11  ;;  %v221_v15 = vrot.slane %v207_v9, %v213_v11  ;;  %v590_v16 = vrot.slane %v1792_v7, %v213_v11  ;;  %v597_v17 = vrot.slane %v583_v10, %v213_v11 }
  0x27   : > { %v949_v24 = vrot.slane %v1803_v12, %v213_v11  ;;  %v956_v25 = vrot.slane %v942_v13, %v213_v11  ;;  %v1308_v36 = vrot.slane %v1814_v34, %v213_v11  ;;  %v1315_v37 = vrot.slane %v1301_v35, %v213_v11 }
  0x28   : > { %v222_v18 = vcombine.high %v214_v14, %v214_v14  ;;  %v223_v19 = vcombine.high %v221_v15, %v221_v15  ;;  %v239_v20 = vsel %vm237_vm0, %v214_v14, 0  ;;  %v245_v21 = vsel %vm237_vm0, %v221_v15, 0 }
  0x29   : > { %v598_v22 = vcombine.high %v590_v16, %v590_v16  ;;  %v599_v23 = vcombine.high %v597_v17, %v597_v17  ;;  %v601_v27 = vsel %vm237_vm0, %v590_v16, 0  ;;  %v607_v28 = vsel %vm237_vm0, %v597_v17, 0 }
  0x2a   : > { %1782 = vmatprep.subr.msk.bf16.mxu0 %vm237_vm0, %v222_v18  ;;  %1787 = vmatprep.subr.msk.bf16.mxu1 %vm237_vm0, %v223_v19  ;;  %v957_v29 = vcombine.high %v949_v24, %v949_v24  ;;  %v958_v30 = vcombine.high %v956_v25, %v956_v25  ;;  %v960_v38 = vsel %vm237_vm0, %v949_v24, 0  ;;  %v966_v39 = vsel %vm237_vm0, %v956_v25, 0 }
  0x2b   : > { %251 = vmatpush1.bf16.msra.mxu0 %v239_v20  ;;  %324 = vmatpush1.bf16.msra.mxu1 %v245_v21  ;;  %v1316_v40 = vcombine.high %v1308_v36, %v1308_v36  ;;  %v1317_v41 = vcombine.high %v1315_v37, %v1315_v37  ;;  %v1319_v42 = vsel %vm237_vm0, %v1308_v36, 0  ;;  %v1325_v43 = vsel %vm237_vm0, %v1315_v37, 0 }
  0x2c   : > { %1793 = vmatprep.subr.msk.bf16.mxu0 %vm237_vm0, %v598_v22  ;;  %1798 = vmatprep.subr.msk.bf16.mxu1 %vm237_vm0, %v599_v23  ;;  %v2263_v7 = vsub.s32 %v553_v52, %v2126_v5 }
  0x2e   : > { %1783 = vmatmul.mubr.msk.bf16.vlgmr.msra.gmra.mrb[0].mxu0 %vm224_vm1, %v2142_v26  ;;  %1788 = vmatmul.mubr.msk.bf16.vlgmr.msra.gmra.mrb[0].mxu1 %vm224_vm1, %v2142_v26 }
  0x2f   : > { %613 = vmatpush1.bf16.msra.mxu0 %v601_v27  ;;  %686 = vmatpush1.bf16.msra.mxu1 %v607_v28 }
  0x30   : > { %292 = vmatprep.mubr.bf16.mxu0 %v2021_v6  ;;  %365 = vmatprep.mubr.bf16.mxu1 %v2021_v6 }
  0x31   : > { %1804 = vmatprep.subr.msk.bf16.mxu0 %vm237_vm0, %v957_v29  ;;  %1809 = vmatprep.subr.msk.bf16.mxu1 %vm237_vm0, %v958_v30 }
  0x36   : > { %1784 = vmatmul.mubr.msk.bf16.gmra.mrb[4].mxu0 %vm224_vm1, %v2157_v31  ;;  %1789 = vmatmul.mubr.msk.bf16.gmra.mrb[4].mxu1 %vm224_vm1, %v2157_v31 }
  0x37   : > { %302 = vmatprep.mubr.bf16.mxu0 %v2021_v6  ;;  %375 = vmatprep.mubr.bf16.mxu1 %v2021_v6 }
  0x3e   : > { %1785 = vmatmul.mubr.msk.bf16.gmra.mrb[8].mxu0 %vm224_vm1, %v2166_v32  ;;  %1790 = vmatmul.mubr.msk.bf16.gmra.mrb[8].mxu1 %vm224_vm1, %v2166_v32 }
  0x3f   : > { %312 = vmatprep.mubr.bf16.mxu0 %v2021_v6  ;;  %385 = vmatprep.mubr.bf16.mxu1 %v2021_v6 }
  0x46   : > { %1786 = vmatmul.mubr.msk.bf16.gmra.mrb[12].mxu0 %vm224_vm1, %v2175_v33  ;;  %1791 = vmatmul.mubr.msk.bf16.gmra.mrb[12].mxu1 %vm224_vm1, %v2175_v33 }
  0x47   : > { %644 = vmatprep.mubr.bf16.mxu0 %v2021_v6  ;;  %717 = vmatprep.mubr.bf16.mxu1 %v2021_v6 }
  0x4e   : > { %1794 = vmatmul.mubr.msk.bf16.vlgmr.msra.gmra.mrb[16].mxu0 %vm224_vm1, %v2142_v26  ;;  %1799 = vmatmul.mubr.msk.bf16.vlgmr.msra.gmra.mrb[16].mxu1 %vm224_vm1, %v2142_v26 }
  0x4f   : > { %972 = vmatpush1.bf16.msra.mxu0 %v960_v38  ;;  %1045 = vmatpush1.bf16.msra.mxu1 %v966_v39 }
  0x50   : > { %654 = vmatprep.mubr.bf16.mxu0 %v2021_v6  ;;  %727 = vmatprep.mubr.bf16.mxu1 %v2021_v6 }
  0x51   : > { %1815 = vmatprep.subr.msk.bf16.mxu0 %vm237_vm0, %v1316_v40  ;;  %1820 = vmatprep.subr.msk.bf16.mxu1 %vm237_vm0, %v1317_v41 }
  0x56   : > { %1795 = vmatmul.mubr.msk.bf16.gmra.mrb[20].mxu0 %vm224_vm1, %v2157_v31  ;;  %1800 = vmatmul.mubr.msk.bf16.gmra.mrb[20].mxu1 %vm224_vm1, %v2157_v31 }
  0x57   : > { %664 = vmatprep.mubr.bf16.mxu0 %v2021_v6  ;;  %737 = vmatprep.mubr.bf16.mxu1 %v2021_v6 }
  0x5e   : > { %1796 = vmatmul.mubr.msk.bf16.gmra.mrb[24].mxu0 %vm224_vm1, %v2166_v32  ;;  %1801 = vmatmul.mubr.msk.bf16.gmra.mrb[24].mxu1 %vm224_vm1, %v2166_v32 }
  0x5f   : > { %674 = vmatprep.mubr.bf16.mxu0 %v2021_v6  ;;  %747 = vmatprep.mubr.bf16.mxu1 %v2021_v6 }
  0x66   : > { %1797 = vmatmul.mubr.msk.bf16.gmra.mrb[28].mxu0 %vm224_vm1, %v2175_v33  ;;  %1802 = vmatmul.mubr.msk.bf16.gmra.mrb[28].mxu1 %vm224_vm1, %v2175_v33 }
  0x67   : > { %1003 = vmatprep.mubr.bf16.mxu0 %v2021_v6  ;;  %1076 = vmatprep.mubr.bf16.mxu1 %v2021_v6 }
  0x6e   : > { %1805 = vmatmul.mubr.msk.bf16.vlgmr.msra.gmra.mrb[32].mxu0 %vm224_vm1, %v2142_v26  ;;  %1810 = vmatmul.mubr.msk.bf16.vlgmr.msra.gmra.mrb[32].mxu1 %vm224_vm1, %v2142_v26 }
  0x6f   : > { %1331 = vmatpush1.bf16.msra.mxu0 %v1319_v42  ;;  %1404 = vmatpush1.bf16.msra.mxu1 %v1325_v43 }
  0x70   : > { %1013 = vmatprep.mubr.bf16.mxu0 %v2021_v6  ;;  %1086 = vmatprep.mubr.bf16.mxu1 %v2021_v6 }
  0x76   : > { %1806 = vmatmul.mubr.msk.bf16.gmra.mrb[36].mxu0 %vm224_vm1, %v2157_v31  ;;  %1811 = vmatmul.mubr.msk.bf16.gmra.mrb[36].mxu1 %vm224_vm1, %v2157_v31 }
  0x77   : > { %1023 = vmatprep.mubr.bf16.mxu0 %v2021_v6  ;;  %1096 = vmatprep.mubr.bf16.mxu1 %v2021_v6 }
  0x7e   : > { %1807 = vmatmul.mubr.msk.bf16.gmra.mrb[40].mxu0 %vm224_vm1, %v2166_v32  ;;  %1812 = vmatmul.mubr.msk.bf16.gmra.mrb[40].mxu1 %vm224_vm1, %v2166_v32 }
  0x7f   : > { %1033 = vmatprep.mubr.bf16.mxu0 %v2021_v6  ;;  %1106 = vmatprep.mubr.bf16.mxu1 %v2021_v6 }
  0x86   : > { %1808 = vmatmul.mubr.msk.bf16.gmra.mrb[44].mxu0 %vm224_vm1, %v2175_v33  ;;  %1813 = vmatmul.mubr.msk.bf16.gmra.mrb[44].mxu1 %vm224_vm1, %v2175_v33 }
  0x87   : > { %1362 = vmatprep.mubr.bf16.mxu0 %v2021_v6  ;;  %1435 = vmatprep.mubr.bf16.mxu1 %v2021_v6 }
  0x8e   : > { %1816 = vmatmul.mubr.msk.bf16.vlgmr.msra.gmra.mrb[48].mxu0 %vm224_vm1, %v2142_v26  ;;  %1821 = vmatmul.mubr.msk.bf16.vlgmr.msra.gmra.mrb[48].mxu1 %vm224_vm1, %v2142_v26 }
  0x8f   : > { %1372 = vmatprep.mubr.bf16.mxu0 %v2021_v6  ;;  %1445 = vmatprep.mubr.bf16.mxu1 %v2021_v6 }
  0x96   : > { %1817 = vmatmul.mubr.msk.bf16.gmra.mrb[52].mxu0 %vm224_vm1, %v2157_v31  ;;  %1822 = vmatmul.mubr.msk.bf16.gmra.mrb[52].mxu1 %vm224_vm1, %v2157_v31 }
  0x97   : > { %1382 = vmatprep.mubr.bf16.mxu0 %v2021_v6  ;;  %1455 = vmatprep.mubr.bf16.mxu1 %v2021_v6 }
  0x9e   : > { %1818 = vmatmul.mubr.msk.bf16.gmra.mrb[56].mxu0 %vm224_vm1, %v2166_v32  ;;  %1823 = vmatmul.mubr.msk.bf16.gmra.mrb[56].mxu1 %vm224_vm1, %v2166_v32 }
  0x9f   : > { %1392 = vmatprep.mubr.bf16.mxu0 %v2021_v6  ;;  %1465 = vmatprep.mubr.bf16.mxu1 %v2021_v6 }
  0xa6   : > { %1819 = vmatmul.mubr.msk.bf16.gmra.mrb[60].mxu0 %vm224_vm1, %v2175_v33  ;;  %1824 = vmatmul.mubr.msk.bf16.gmra.mrb[60].mxu1 %vm224_vm1, %v2175_v33 }
 0x101   : > { %v284_v46 = vpop.f32.mrb[0].mxu0  ;;  %v357_v47 = vpop.f32.mrb[0].mxu1 }
 0x102   : > { %v396_v48 = vmax.f32 %v284_v46, 1e-06  ;;  %v398_v49 = vmax.f32 %v357_v47, 1e-06  ;;  %v286_v50 = vpop.f32.mrb[1].mxu0  ;;  %v359_v51 = vpop.f32.mrb[1].mxu1 }
 0x103   : > { %v397_v53 = vmax.f32 %v286_v50, 1e-06  ;;  %v399_v54 = vmax.f32 %v359_v51, 1e-06  ;;  %v288_v55 = vpop.f32.mrb[2].mxu0  ;;  %v361_v56 = vpop.f32.mrb[2].mxu1 }
 0x104   : > { %v429_v57 = vmul.f32 %v396_v48, %v396_v48  ;;  %v431_v58 = vmul.f32 %v398_v49, %v398_v49  ;;  %v400_v59 = vmax.f32 %v288_v55, 1e-06  ;;  %v402_v60 = vmax.f32 %v361_v56, 1e-06  ;;  %v290_v61 = vpop.f32.mrb[3].mxu0  ;;  %v363_v62 = vpop.f32.mrb[3].mxu1 }
 0x105   : > { %v430_v63 = vmul.f32 %v397_v53, %v397_v53  ;;  %v432_v0 = vmul.f32 %v399_v54, %v399_v54  ;;  %v401_v1 = vmax.f32 %v290_v61, 1e-06  ;;  %v403_v3 = vmax.f32 %v363_v62, 1e-06 }
 0x106   : > { %v433_v4 = vmul.f32 %v400_v59, %v400_v59  ;;  %v435_v6 = vmul.f32 %v402_v60, %v402_v60  ;;  %v461_v10 = vmul.f32 %v429_v57, %v396_v48  ;;  %v463_v11 = vmul.f32 %v431_v58, %v398_v49 }
 0x107   : > { %v434_v8 = vmul.f32 %v401_v1, %v401_v1  ;;  %v436_v9 = vmul.f32 %v403_v3, %v403_v3  ;;  %v462_v14 = vmul.f32 %v430_v63, %v397_v53  ;;  %v464_v15 = vmul.f32 %v432_v0, %v399_v54 }
 0x108   : > { %v465_v12 = vmul.f32 %v433_v4, %v400_v59  ;;  %v467_v13 = vmul.f32 %v435_v6, %v402_v60 }
 0x109   : > { %v466_v16 = vmul.f32 %v434_v8, %v401_v1  ;;  %v468_v17 = vmul.f32 %v436_v9, %v403_v3  ;;  %v294_v18 = vpop.f32.mrb[4].mxu0  ;;  %v367_v19 = vpop.f32.mrb[4].mxu1 }
 0x10a   : > { %v493_v20 = vadd.f32 %v465_v12, %v461_v10  ;;  %v519_v21 = vadd.f32 %v467_v13, %v463_v11  ;;  %v404_v22 = vmax.f32 %v294_v18, 1e-06  ;;  %v406_v23 = vmax.f32 %v367_v19, 1e-06  ;;  %v296_v24 = vpop.f32.mrb[5].mxu0  ;;  %v369_v25 = vpop.f32.mrb[5].mxu1 }
 0x10b   : > { %v506_v5 = vadd.f32 %v466_v16, %v462_v14  ;;  %v532_v26 = vadd.f32 %v468_v17, %v464_v15  ;;  %v405_v27 = vmax.f32 %v296_v24, 1e-06  ;;  %v407_v28 = vmax.f32 %v369_v25, 1e-06  ;;  %v298_v29 = vpop.f32.mrb[6].mxu0  ;;  %v371_v30 = vpop.f32.mrb[6].mxu1 }
 0x10c   : > { %v437_v31 = vmul.f32 %v404_v22, %v404_v22  ;;  %v439_v32 = vmul.f32 %v406_v23, %v406_v23  ;;  %v408_v33 = vmax.f32 %v298_v29, 1e-06  ;;  %v410_v34 = vmax.f32 %v371_v30, 1e-06  ;;  %v300_v35 = vpop.f32.mrb[7].mxu0  ;;  %v373_v36 = vpop.f32.mrb[7].mxu1 }
 0x10d   : > { %v438_v37 = vmul.f32 %v405_v27, %v405_v27  ;;  %v440_v38 = vmul.f32 %v407_v28, %v407_v28  ;;  %v409_v39 = vmax.f32 %v300_v35, 1e-06  ;;  %v411_v40 = vmax.f32 %v373_v36, 1e-06 }
 0x10e   : > { %v469_v41 = vmul.f32 %v437_v31, %v404_v22  ;;  %v471_v42 = vmul.f32 %v439_v32, %v406_v23  ;;  %v441_v43 = vmul.f32 %v408_v33, %v408_v33  ;;  %v443_v44 = vmul.f32 %v410_v34, %v410_v34 }
 0x10f   : > { %v470_v45 = vmul.f32 %v438_v37, %v405_v27  ;;  %v472_v46 = vmul.f32 %v440_v38, %v407_v28  ;;  %v442_v47 = vmul.f32 %v409_v39, %v409_v39  ;;  %v444_v48 = vmul.f32 %v411_v40, %v411_v40 }
 0x110   : > { %v494_v49 = vadd.f32 %v493_v20, %v469_v41  ;;  %v520_v50 = vadd.f32 %v519_v21, %v471_v42  ;;  %v473_v51 = vmul.f32 %v441_v43, %v408_v33  ;;  %v475_v52 = vmul.f32 %v443_v44, %v410_v34 }
 0x111   : > { %v507_v53 = vadd.f32 %v506_v5, %v470_v45  ;;  %v533_v54 = vadd.f32 %v532_v26, %v472_v46  ;;  %v474_v55 = vmul.f32 %v442_v47, %v409_v39  ;;  %v476_v56 = vmul.f32 %v444_v48, %v411_v40  ;;  %v304_v57 = vpop.f32.mrb[8].mxu0  ;;  %v377_v58 = vpop.f32.mrb[8].mxu1 }
 0x112   : > { %v495_v59 = vadd.f32 %v494_v49, %v473_v51  ;;  %v521_v60 = vadd.f32 %v520_v50, %v475_v52  ;;  %v412_v61 = vmax.f32 %v304_v57, 1e-06  ;;  %v414_v62 = vmax.f32 %v377_v58, 1e-06  ;;  %v306_v63 = vpop.f32.mrb[9].mxu0  ;;  %v379_v0 = vpop.f32.mrb[9].mxu1 }
 0x113   : > { %v508_v1 = vadd.f32 %v507_v53, %v474_v55  ;;  %v534_v3 = vadd.f32 %v533_v54, %v476_v56  ;;  %v413_v4 = vmax.f32 %v306_v63, 1e-06  ;;  %v415_v6 = vmax.f32 %v379_v0, 1e-06  ;;  %v308_v8 = vpop.f32.mrb[10].mxu0  ;;  %v381_v9 = vpop.f32.mrb[10].mxu1 }
 0x114   : > { %v445_v10 = vmul.f32 %v412_v61, %v412_v61  ;;  %v447_v11 = vmul.f32 %v414_v62, %v414_v62  ;;  %v416_v12 = vmax.f32 %v308_v8, 1e-06  ;;  %v418_v13 = vmax.f32 %v381_v9, 1e-06  ;;  %v310_v14 = vpop.f32.mrb[11].mxu0  ;;  %v383_v15 = vpop.f32.mrb[11].mxu1 }
 0x115   : > { %v446_v16 = vmul.f32 %v413_v4, %v413_v4  ;;  %v448_v17 = vmul.f32 %v415_v6, %v415_v6  ;;  %v417_v18 = vmax.f32 %v310_v14, 1e-06  ;;  %v419_v19 = vmax.f32 %v383_v15, 1e-06 }
 0x116   : > { %v477_v20 = vmul.f32 %v445_v10, %v412_v61  ;;  %v479_v21 = vmul.f32 %v447_v11, %v414_v62  ;;  %v449_v22 = vmul.f32 %v416_v12, %v416_v12  ;;  %v451_v23 = vmul.f32 %v418_v13, %v418_v13 }
 0x117   : > { %v478_v24 = vmul.f32 %v446_v16, %v413_v4  ;;  %v480_v25 = vmul.f32 %v448_v17, %v415_v6  ;;  %v450_v5 = vmul.f32 %v417_v18, %v417_v18  ;;  %v452_v26 = vmul.f32 %v419_v19, %v419_v19 }
 0x118   : > { %v496_v27 = vadd.f32 %v495_v59, %v477_v20  ;;  %v522_v28 = vadd.f32 %v521_v60, %v479_v21  ;;  %v481_v29 = vmul.f32 %v449_v22, %v416_v12  ;;  %v483_v30 = vmul.f32 %v451_v23, %v418_v13 }
 0x119   : > { %v509_v31 = vadd.f32 %v508_v1, %v478_v24  ;;  %v535_v32 = vadd.f32 %v534_v3, %v480_v25  ;;  %v482_v33 = vmul.f32 %v450_v5, %v417_v18  ;;  %v484_v34 = vmul.f32 %v452_v26, %v419_v19  ;;  %v314_v35 = vpop.f32.mrb[12].mxu0  ;;  %v387_v36 = vpop.f32.mrb[12].mxu1 }
 0x11a   : > { %v497_v37 = vadd.f32 %v496_v27, %v481_v29  ;;  %v523_v38 = vadd.f32 %v522_v28, %v483_v30  ;;  %v420_v39 = vmax.f32 %v314_v35, 1e-06  ;;  %v422_v40 = vmax.f32 %v387_v36, 1e-06  ;;  %v316_v41 = vpop.f32.mrb[13].mxu0  ;;  %v389_v42 = vpop.f32.mrb[13].mxu1 }
 0x11b   : > { %v510_v43 = vadd.f32 %v509_v31, %v482_v33  ;;  %v536_v44 = vadd.f32 %v535_v32, %v484_v34  ;;  %v421_v45 = vmax.f32 %v316_v41, 1e-06  ;;  %v423_v46 = vmax.f32 %v389_v42, 1e-06  ;;  %v318_v47 = vpop.f32.mrb[14].mxu0  ;;  %v391_v48 = vpop.f32.mrb[14].mxu1 }
 0x11c   : > { %v453_v49 = vmul.f32 %v420_v39, %v420_v39  ;;  %v455_v50 = vmul.f32 %v422_v40, %v422_v40  ;;  %v424_v51 = vmax.f32 %v318_v47, 1e-06  ;;  %v426_v52 = vmax.f32 %v391_v48, 1e-06  ;;  %v320_v53 = vpop.f32.mrb[15].mxu0  ;;  %v393_v54 = vpop.f32.mrb[15].mxu1 }
 0x11d   : > { %v454_v55 = vmul.f32 %v421_v45, %v421_v45  ;;  %v456_v56 = vmul.f32 %v423_v46, %v423_v46  ;;  %v425_v57 = vmax.f32 %v320_v53, 1e-06  ;;  %v427_v58 = vmax.f32 %v393_v54, 1e-06 }
 0x11e   : > { %v485_v59 = vmul.f32 %v453_v49, %v420_v39  ;;  %v487_v60 = vmul.f32 %v455_v50, %v422_v40  ;;  %v457_v61 = vmul.f32 %v424_v51, %v424_v51  ;;  %v459_v62 = vmul.f32 %v426_v52, %v426_v52 }
 0x11f   : > { %v486_v63 = vmul.f32 %v454_v55, %v421_v45  ;;  %v488_v0 = vmul.f32 %v456_v56, %v423_v46  ;;  %v458_v1 = vmul.f32 %v425_v57, %v425_v57  ;;  %v460_v3 = vmul.f32 %v427_v58, %v427_v58 }
 0x120   : > { %v498_v4 = vadd.f32 %v497_v37, %v485_v59  ;;  %v524_v6 = vadd.f32 %v523_v38, %v487_v60  ;;  %v489_v8 = vmul.f32 %v457_v61, %v424_v51  ;;  %v491_v9 = vmul.f32 %v459_v62, %v426_v52 }
 0x121   : > { %v511_v10 = vadd.f32 %v510_v43, %v486_v63  ;;  %v537_v11 = vadd.f32 %v536_v44, %v488_v0  ;;  %v490_v12 = vmul.f32 %v458_v1, %v425_v57  ;;  %v492_v13 = vmul.f32 %v460_v3, %v427_v58  ;;  %v646_v14 = vpop.f32.mrb[16].mxu0  ;;  %v719_v15 = vpop.f32.mrb[16].mxu1 }
 0x122   : > { %v499_v16 = vadd.f32 %v498_v4, %v489_v8  ;;  %v525_v17 = vadd.f32 %v524_v6, %v491_v9  ;;  %v758_v18 = vmax.f32 %v646_v14, 1e-06  ;;  %v760_v19 = vmax.f32 %v719_v15, 1e-06  ;;  %v648_v20 = vpop.f32.mrb[17].mxu0  ;;  %v721_v21 = vpop.f32.mrb[17].mxu1 }
 0x123   : > { %v512_v22 = vadd.f32 %v511_v10, %v490_v12  ;;  %v538_v23 = vadd.f32 %v537_v11, %v492_v13  ;;  %v759_v24 = vmax.f32 %v648_v20, 1e-06  ;;  %v761_v25 = vmax.f32 %v721_v21, 1e-06  ;;  %v650_v5 = vpop.f32.mrb[18].mxu0  ;;  %v723_v26 = vpop.f32.mrb[18].mxu1 }
 0x124   : > { %v500_v27 = vrot.slane %v499_v16, 4  ;;  %v526_v28 = vrot.slane %v525_v17, 4  ;;  %v792_v29 = vmul.f32 %v758_v18, %v758_v18  ;;  %v794_v30 = vmul.f32 %v760_v19, %v760_v19  ;;  %v652_v31 = vpop.f32.mrb[19].mxu0  ;;  %v725_v32 = vpop.f32.mrb[19].mxu1 }
 0x125   : > { %v513_v33 = vrot.slane %v512_v22, 4  ;;  %v539_v34 = vrot.slane %v538_v23, 4  ;;  %v793_v35 = vmul.f32 %v759_v24, %v759_v24  ;;  %v795_v36 = vmul.f32 %v761_v25, %v761_v25 }
 0x126   : > { %v501_v37 = vadd.f32 %v500_v27, %v499_v16  ;;  %v527_v38 = vadd.f32 %v526_v28, %v525_v17  ;;  %v824_v39 = vmul.f32 %v792_v29, %v758_v18  ;;  %v826_v40 = vmul.f32 %v794_v30, %v760_v19 }
 0x127   : > { %v514_v41 = vadd.f32 %v513_v33, %v512_v22  ;;  %v540_v42 = vadd.f32 %v539_v34, %v538_v23  ;;  %v825_v43 = vmul.f32 %v793_v35, %v759_v24  ;;  %v827_v44 = vmul.f32 %v795_v36, %v761_v25 }
 0x128   : > { %v502_v45 = vrot.slane %v501_v37, 2  ;;  %v528_v46 = vrot.slane %v527_v38, 2  ;;  %v762_v47 = vmax.f32 %v650_v5, 1e-06  ;;  %v764_v48 = vmax.f32 %v723_v26, 1e-06 }
 0x129   : > { %v515_v49 = vrot.slane %v514_v41, 2  ;;  %v541_v50 = vrot.slane %v540_v42, 2  ;;  %v763_v51 = vmax.f32 %v652_v31, 1e-06  ;;  %v765_v52 = vmax.f32 %v725_v32, 1e-06 }
 0x12a   : > { %v503_v53 = vadd.f32 %v502_v45, %v501_v37  ;;  %v529_v54 = vadd.f32 %v528_v46, %v527_v38  ;;  %v796_v55 = vmul.f32 %v762_v47, %v762_v47  ;;  %v798_v56 = vmul.f32 %v764_v48, %v764_v48  ;;  %v656_v57 = vpop.f32.mrb[20].mxu0  ;;  %v729_v58 = vpop.f32.mrb[20].mxu1 }
 0x12b   : > { %v516_v59 = vadd.f32 %v515_v49, %v514_v41  ;;  %v542_v60 = vadd.f32 %v541_v50, %v540_v42  ;;  %v797_v61 = vmul.f32 %v763_v51, %v763_v51  ;;  %v799_v62 = vmul.f32 %v765_v52, %v765_v52  ;;  %v658_v63 = vpop.f32.mrb[21].mxu0  ;;  %v731_v0 = vpop.f32.mrb[21].mxu1 }
 0x12c   : > { %v504_v1 = vrot.slane %v503_v53, 1  ;;  %v530_v3 = vrot.slane %v529_v54, 1  ;;  %v828_v4 = vmul.f32 %v796_v55, %v762_v47  ;;  %v830_v6 = vmul.f32 %v798_v56, %v764_v48  ;;  %v660_v8 = vpop.f32.mrb[22].mxu0  ;;  %v733_v9 = vpop.f32.mrb[22].mxu1 }
 0x12d   : > { %v517_v10 = vrot.slane %v516_v59, 1  ;;  %v543_v11 = vrot.slane %v542_v60, 1  ;;  %v829_v12 = vmul.f32 %v797_v61, %v763_v51  ;;  %v831_v13 = vmul.f32 %v799_v62, %v765_v52  ;;  %v662_v14 = vpop.f32.mrb[23].mxu0  ;;  %v735_v15 = vpop.f32.mrb[23].mxu1 }
 0x12e   : > { %v505_v16 = vadd.f32 %v504_v1, %v503_v53  ;;  %v531_v17 = vadd.f32 %v530_v3, %v529_v54  ;;  %v856_v18 = vadd.f32 %v828_v4, %v824_v39  ;;  %v882_v19 = vadd.f32 %v830_v6, %v826_v40  ;;  %v428_v54 = vld [vmem:[#allocation2] sm:$0xf] }
 0x12f   : > { %v518_v20 = vadd.f32 %v517_v10, %v516_v59  ;;  %v544_v21 = vadd.f32 %v543_v11, %v542_v60  ;;  %v869_v22 = vadd.f32 %v829_v12, %v825_v43  ;;  %v895_v23 = vadd.f32 %v831_v13, %v827_v44 }
 0x130   : > { %v766_v25 = vmax.f32 %v656_v57, 1e-06  ;;  %v768_v5 = vmax.f32 %v729_v58, 1e-06  ;;  %v767_v26 = vmax.f32 %v658_v63, 1e-06 }
 0x131   : > { %v549_v27 = vcombine.low %v505_v16, %v518_v20  ;;  %v550_v28 = vcombine.low %v531_v17, %v544_v21  ;;  %v769_v29 = vmax.f32 %v731_v0, 1e-06  ;;  %v770_v30 = vmax.f32 %v660_v8, 1e-06  ;;  %v666_v31 = vpop.f32.mrb[24].mxu0  ;;  %v739_v32 = vpop.f32.mrb[24].mxu1 }
 0x132   : > { %v800_v33 = vmul.f32 %v766_v25, %v766_v25  ;;  %v802_v34 = vmul.f32 %v768_v5, %v768_v5  ;;  %v801_v35 = vmul.f32 %v767_v26, %v767_v26  ;;  %v772_v36 = vmax.f32 %v733_v9, 1e-06  ;;  %v668_v37 = vpop.f32.mrb[25].mxu0  ;;  %v741_v38 = vpop.f32.mrb[25].mxu1 }
 0x133   : > { %v557_v2 = vrot.slane %v549_v27, %v2263_v7  ;;  %v564_v39 = vrot.slane %v550_v28, %v2263_v7  ;;  %v803_v40 = vmul.f32 %v769_v29, %v769_v29  ;;  %v804_v41 = vmul.f32 %v770_v30, %v770_v30  ;;  %v670_v42 = vpop.f32.mrb[26].mxu0  ;;  %v743_v43 = vpop.f32.mrb[26].mxu1 }
 0x134   : > { %v832_v44 = vmul.f32 %v800_v33, %v766_v25  ;;  %v834_v45 = vmul.f32 %v802_v34, %v768_v5  ;;  %v833_v46 = vmul.f32 %v801_v35, %v767_v26  ;;  %v806_v47 = vmul.f32 %v772_v36, %v772_v36  ;;  %v672_v48 = vpop.f32.mrb[27].mxu0  ;;  %v745_v49 = vpop.f32.mrb[27].mxu1 }
 0x135   : > { %v565_v50 = vcombine.low %v557_v2, %v564_v39  ;;  %v835_v51 = vmul.f32 %v803_v40, %v769_v29  ;;  %v836_v52 = vmul.f32 %v804_v41, %v770_v30  ;;  %v771_v53 = vmax.f32 %v662_v14, 1e-06 }
 0x136   : > { %v857_v55 = vadd.f32 %v856_v18, %v832_v44  ;;  %v883_v56 = vadd.f32 %v882_v19, %v834_v45  ;;  %v870_v57 = vadd.f32 %v869_v22, %v833_v46  ;;  %v838_v58 = vmul.f32 %v806_v47, %v772_v36 }
 0x137   : > { %v572_v59 = vrot.slane %v565_v50, %v2263_v7  ;;  %v896_v60 = vadd.f32 %v895_v23, %v835_v51  ;;  %v805_v61 = vmul.f32 %v771_v53, %v771_v53  ;;  %v773_v62 = vmax.f32 %v735_v15, 1e-06 }
 0x138   : > { %v858_v63 = vadd.f32 %v857_v55, %v836_v52  ;;  %v884_v0 = vadd.f32 %v883_v56, %v838_v58  ;;  %v774_v1 = vmax.f32 %v666_v31, 1e-06  ;;  %v776_v3 = vmax.f32 %v739_v32, 1e-06 }
 0x139   : > { %v574_v4 = vadd.f32 %v572_v59, %v428_v54  ;;  %v837_v6 = vmul.f32 %v805_v61, %v771_v53  ;;  %v807_v8 = vmul.f32 %v773_v62, %v773_v62  ;;  %v775_v9 = vmax.f32 %v668_v37, 1e-06  ;;  %v676_v10 = vpop.f32.mrb[28].mxu0  ;;  %v749_v11 = vpop.f32.mrb[28].mxu1 }
 0x13a   : > { %v808_v12 = vmul.f32 %v774_v1, %v774_v1  ;;  %v810_v13 = vmul.f32 %v776_v3, %v776_v3  ;;  %v777_v14 = vmax.f32 %v741_v38, 1e-06  ;;  %v778_v16 = vmax.f32 %v670_v42, 1e-06  ;;  %v678_v17 = vpop.f32.mrb[29].mxu0  ;;  %v751_v18 = vpop.f32.mrb[29].mxu1 }
 0x13b   : > { %579 = vst.msk [vmem:[#allocation2] sm:$0xf] %vm2266_vm2, %v574_v4  ;;  %v871_v15 = vadd.f32 %v870_v57, %v837_v6  ;;  %v839_v19 = vmul.f32 %v807_v8, %v773_v62  ;;  %v809_v20 = vmul.f32 %v775_v9, %v775_v9  ;;  %v780_v21 = vmax.f32 %v743_v43, 1e-06  ;;  %v680_v22 = vpop.f32.mrb[30].mxu0  ;;  %v753_v23 = vpop.f32.mrb[30].mxu1 }
 0x13c   : > { %v840_v25 = vmul.f32 %v808_v12, %v774_v1  ;;  %v842_v5 = vmul.f32 %v810_v13, %v776_v3  ;;  %v811_v26 = vmul.f32 %v777_v14, %v777_v14  ;;  %v812_v27 = vmul.f32 %v778_v16, %v778_v16  ;;  %v682_v28 = vpop.f32.mrb[31].mxu0  ;;  %v755_v29 = vpop.f32.mrb[31].mxu1 }
 0x13d   : > { %v897_v30 = vadd.f32 %v896_v60, %v839_v19  ;;  %v841_v31 = vmul.f32 %v809_v20, %v775_v9  ;;  %v814_v32 = vmul.f32 %v780_v21, %v780_v21  ;;  %v779_v33 = vmax.f32 %v672_v48, 1e-06 }
 0x13e   : > { %v859_v34 = vadd.f32 %v858_v63, %v840_v25  ;;  %v885_v35 = vadd.f32 %v884_v0, %v842_v5  ;;  %v843_v36 = vmul.f32 %v811_v26, %v777_v14  ;;  %v844_v37 = vmul.f32 %v812_v27, %v778_v16 }
 0x13f   : > { %v872_v38 = vadd.f32 %v871_v15, %v841_v31  ;;  %v846_v2 = vmul.f32 %v814_v32, %v780_v21  ;;  %v813_v39 = vmul.f32 %v779_v33, %v779_v33  ;;  %v781_v40 = vmax.f32 %v745_v49, 1e-06 }
 0x140   : > { %v898_v41 = vadd.f32 %v897_v30, %v843_v36  ;;  %v860_v42 = vadd.f32 %v859_v34, %v844_v37  ;;  %v782_v43 = vmax.f32 %v676_v10, 1e-06  ;;  %v784_v44 = vmax.f32 %v749_v11, 1e-06 }
 0x141   : > { %v886_v45 = vadd.f32 %v885_v35, %v846_v2  ;;  %v845_v46 = vmul.f32 %v813_v39, %v779_v33  ;;  %v815_v47 = vmul.f32 %v781_v40, %v781_v40  ;;  %v783_v50 = vmax.f32 %v678_v17, 1e-06  ;;  %v1005_v51 = vpop.f32.mrb[32].mxu0  ;;  %v1078_v52 = vpop.f32.mrb[32].mxu1 }
 0x142   : > { %v816_v53 = vmul.f32 %v782_v43, %v782_v43  ;;  %v818_v48 = vmul.f32 %v784_v44, %v784_v44  ;;  %v785_v54 = vmax.f32 %v751_v18, 1e-06  ;;  %v786_v55 = vmax.f32 %v680_v22, 1e-06  ;;  %v1007_v56 = vpop.f32.mrb[33].mxu0  ;;  %v1080_v57 = vpop.f32.mrb[33].mxu1 }
 0x143   : > { %v873_v58 = vadd.f32 %v872_v38, %v845_v46  ;;  %v847_v59 = vmul.f32 %v815_v47, %v781_v40  ;;  %v817_v60 = vmul.f32 %v783_v50, %v783_v50  ;;  %v788_v49 = vmax.f32 %v753_v23, 1e-06  ;;  %v1009_v61 = vpop.f32.mrb[34].mxu0  ;;  %v1082_v62 = vpop.f32.mrb[34].mxu1 }
 0x144   : > { %v848_v63 = vmul.f32 %v816_v53, %v782_v43  ;;  %v850_v0 = vmul.f32 %v818_v48, %v784_v44  ;;  %v819_v1 = vmul.f32 %v785_v54, %v785_v54  ;;  %v820_v3 = vmul.f32 %v786_v55, %v786_v55  ;;  %v1011_v4 = vpop.f32.mrb[35].mxu0  ;;  %v1084_v6 = vpop.f32.mrb[35].mxu1 }
 0x145   : > { %v899_v8 = vadd.f32 %v898_v41, %v847_v59  ;;  %v849_v9 = vmul.f32 %v817_v60, %v783_v50  ;;  %v822_v10 = vmul.f32 %v788_v49, %v788_v49  ;;  %v787_v11 = vmax.f32 %v682_v28, 1e-06 }
 0x146   : > { %v861_v12 = vadd.f32 %v860_v42, %v848_v63  ;;  %v887_v13 = vadd.f32 %v886_v45, %v850_v0  ;;  %v851_v14 = vmul.f32 %v819_v1, %v785_v54  ;;  %v852_v16 = vmul.f32 %v820_v3, %v786_v55 }
 0x147   : > { %v874_v17 = vadd.f32 %v873_v58, %v849_v9  ;;  %v854_v18 = vmul.f32 %v822_v10, %v788_v49  ;;  %v821_v15 = vmul.f32 %v787_v11, %v787_v11  ;;  %v789_v19 = vmax.f32 %v755_v29, 1e-06 }
 0x148   : > { %v900_v20 = vadd.f32 %v899_v8, %v851_v14  ;;  %v862_v21 = vadd.f32 %v861_v12, %v852_v16  ;;  %v1117_v22 = vmax.f32 %v1005_v51, 1e-06  ;;  %v1119_v23 = vmax.f32 %v1078_v52, 1e-06 }
 0x149   : > { %v888_v25 = vadd.f32 %v887_v13, %v854_v18  ;;  %v853_v5 = vmul.f32 %v821_v15, %v787_v11  ;;  %v823_v26 = vmul.f32 %v789_v19, %v789_v19  ;;  %v1118_v27 = vmax.f32 %v1007_v56, 1e-06  ;;  %v2275_v30 = vpop.f32.mrb[36].mxu0  ;;  %v2277_v31 = vpop.f32.mrb[36].mxu1 }
 0x14a   : > { %v863_v28 = vrot.slane %v862_v21, 4  ;;  %v1151_v32 = vmul.f32 %v1117_v22, %v1117_v22  ;;  %v1153_v33 = vmul.f32 %v1119_v23, %v1119_v23  ;;  %v1120_v34 = vmax.f32 %v1080_v57, 1e-06  ;;  %v1017_v35 = vpop.f32.mrb[37].mxu0  ;;  %v1090_v36 = vpop.f32.mrb[37].mxu1 }
 0x14b   : > { %v889_v37 = vrot.slane %v888_v25, 4  ;;  %v875_v29 = vadd.f32 %v874_v17, %v853_v5  ;;  %v855_v38 = vmul.f32 %v823_v26, %v789_v19  ;;  %v1152_v2 = vmul.f32 %v1118_v27, %v1118_v27  ;;  %v1019_v39 = vpop.f32.mrb[38].mxu0  ;;  %v1092_v40 = vpop.f32.mrb[38].mxu1 }
 0x14c   : > { %v864_v41 = vadd.f32 %v863_v28, %v862_v21  ;;  %v1183_v42 = vmul.f32 %v1151_v32, %v1117_v22  ;;  %v1185_v43 = vmul.f32 %v1153_v33, %v1119_v23  ;;  %v1154_v44 = vmul.f32 %v1120_v34, %v1120_v34  ;;  %v2279_v45 = vpop.f32.mrb[39].mxu0  ;;  %v2281_v46 = vpop.f32.mrb[39].mxu1 }
 0x14d   : > { %v890_v47 = vadd.f32 %v889_v37, %v888_v25  ;;  %v876_v50 = vrot.slane %v875_v29, 4  ;;  %v901_v51 = vadd.f32 %v900_v20, %v855_v38  ;;  %v1184_v52 = vmul.f32 %v1152_v2, %v1118_v27 }
 0x14e   : > { %v865_v53 = vrot.slane %v864_v41, 2  ;;  %v1186_v48 = vmul.f32 %v1154_v44, %v1120_v34  ;;  %v1121_v54 = vmax.f32 %v1009_v61, 1e-06  ;;  %v1123_v55 = vmax.f32 %v1082_v62, 1e-06 }
 0x14f   : > { %v891_v56 = vrot.slane %v890_v47, 2  ;;  %v877_v57 = vadd.f32 %v876_v50, %v875_v29  ;;  %v902_v58 = vrot.slane %v901_v51, 4  ;;  %v1122_v59 = vmax.f32 %v1011_v4, 1e-06 }
 0x150   : > { %v866_v60 = vadd.f32 %v865_v53, %v864_v41  ;;  %v1155_v49 = vmul.f32 %v1121_v54, %v1121_v54  ;;  %v1157_v63 = vmul.f32 %v1123_v55, %v1123_v55  ;;  %v1124_v0 = vmax.f32 %v1084_v6, 1e-06 }
 0x151   : > { %v892_v1 = vadd.f32 %v891_v56, %v890_v47  ;;  %v878_v3 = vrot.slane %v877_v57, 2  ;;  %v903_v8 = vadd.f32 %v902_v58, %v901_v51  ;;  %v1156_v9 = vmul.f32 %v1122_v59, %v1122_v59  ;;  %v2283_v10 = vpop.f32.mrb[40].mxu0  ;;  %v2285_v11 = vpop.f32.mrb[40].mxu1 }
 0x152   : > { %v867_v12 = vrot.slane %v866_v60, 1  ;;  %v1187_v13 = vmul.f32 %v1155_v49, %v1121_v54  ;;  %v1189_v61 = vmul.f32 %v1157_v63, %v1123_v55  ;;  %v1158_v62 = vmul.f32 %v1124_v0, %v1124_v0  ;;  %v2287_v14 = vpop.f32.mrb[41].mxu0  ;;  %v2289_v16 = vpop.f32.mrb[41].mxu1 }
 0x153   : > { %v893_v4 = vrot.slane %v892_v1, 1  ;;  %v879_v17 = vadd.f32 %v878_v3, %v877_v57  ;;  %v904_v18 = vrot.slane %v903_v8, 2  ;;  %v1188_v6 = vmul.f32 %v1156_v9, %v1122_v59  ;;  %v2291_v15 = vpop.f32.mrb[42].mxu0  ;;  %v2293_v19 = vpop.f32.mrb[42].mxu1 }
 0x154   : > { %v868_v20 = vadd.f32 %v867_v12, %v866_v60  ;;  %v1215_v21 = vadd.f32 %v1187_v13, %v1183_v42  ;;  %v1241_v22 = vadd.f32 %v1189_v61, %v1185_v43  ;;  %v1190_v23 = vmul.f32 %v1158_v62, %v1124_v0  ;;  %v2295_v25 = vpop.f32.mrb[43].mxu0  ;;  %v2297_v5 = vpop.f32.mrb[43].mxu1 }
 0x155   : > { %v894_v26 = vadd.f32 %v893_v4, %v892_v1  ;;  %v880_v27 = vrot.slane %v879_v17, 1  ;;  %v905_v28 = vadd.f32 %v904_v18, %v903_v8  ;;  %v1228_v32 = vadd.f32 %v1188_v6, %v1184_v52 }
 0x156   : > { %v1254_v33 = vadd.f32 %v1190_v23, %v1186_v48  ;;  %v1125_v34 = vmax.f32 %v2275_v30, 1e-06  ;;  %v1127_v37 = vmax.f32 %v2277_v31, 1e-06  ;;  %v1126_v29 = vmax.f32 %v1017_v35, 1e-06 }
 0x157   : > { %v881_v38 = vadd.f32 %v880_v27, %v879_v17  ;;  %v906_v2 = vrot.slane %v905_v28, 1  ;;  %v1128_v41 = vmax.f32 %v1090_v36, 1e-06  ;;  %v1129_v42 = vmax.f32 %v1019_v39, 1e-06 }
 0x158   : > { %v1159_v43 = vmul.f32 %v1125_v34, %v1125_v34  ;;  %v1161_v44 = vmul.f32 %v1127_v37, %v1127_v37  ;;  %v1160_v47 = vmul.f32 %v1126_v29, %v1126_v29  ;;  %v1131_v50 = vmax.f32 %v1092_v40, 1e-06 }
 0x159   : > { %v912_v51 = vcombine.low %v868_v20, %v881_v38  ;;  %v907_v53 = vadd.f32 %v906_v2, %v905_v28  ;;  %v1162_v54 = vmul.f32 %v1128_v41, %v1128_v41  ;;  %v1163_v55 = vmul.f32 %v1129_v42, %v1129_v42  ;;  %v2301_v56 = vpop.f32.mrb[44].mxu0  ;;  %v2303_v52 = vpop.f32.mrb[44].mxu1 }
 0x15a   : > { %v1191_v30 = vmul.f32 %v1159_v43, %v1125_v34  ;;  %v1193_v48 = vmul.f32 %v1161_v44, %v1127_v37  ;;  %v1192_v31 = vmul.f32 %v1160_v47, %v1126_v29  ;;  %v1165_v35 = vmul.f32 %v1131_v50, %v1131_v50  ;;  %v2305_v57 = vpop.f32.mrb[45].mxu0  ;;  %v2307_v36 = vpop.f32.mrb[45].mxu1 }
 0x15b   : > { %v920_v39 = vrot.slane %v912_v51, %v2263_v7  ;;  %v913_v58 = vcombine.low %v894_v26, %v907_v53  ;;  %v1194_v40 = vmul.f32 %v1162_v54, %v1128_v41  ;;  %v1195_v59 = vmul.f32 %v1163_v55, %v1129_v42  ;;  %v2310_v60 = vpop.f32.mrb[46].mxu0  ;;  %v2312_v49 = vpop.f32.mrb[46].mxu1  ;;  %v791_v26 = vld [vmem:[#allocation2 + $0x4] sm:$0xf] }
 0x15c   : > { %v1216_v63 = vadd.f32 %v1215_v21, %v1191_v30  ;;  %v1242_v0 = vadd.f32 %v1241_v22, %v1193_v48  ;;  %v1229_v1 = vadd.f32 %v1228_v32, %v1192_v31  ;;  %v1197_v3 = vmul.f32 %v1165_v35, %v1131_v50  ;;  %v2314_v8 = vpop.f32.mrb[47].mxu0  ;;  %v2316_v9 = vpop.f32.mrb[47].mxu1 }
 0x15d   : > { %v927_v12 = vrot.slane %v913_v58, %v2263_v7  ;;  %v1255_v13 = vadd.f32 %v1254_v33, %v1194_v40  ;;  %v1130_v61 = vmax.f32 %v2279_v45, 1e-06  ;;  %v1132_v62 = vmax.f32 %v2281_v46, 1e-06 }
 0x15e   : > { %v1217_v4 = vadd.f32 %v1216_v63, %v1195_v59  ;;  %v1243_v17 = vadd.f32 %v1242_v0, %v1197_v3  ;;  %v1133_v18 = vmax.f32 %v2283_v10, 1e-06  ;;  %v1135_v6 = vmax.f32 %v2285_v11, 1e-06 }
 0x15f   : > { %v928_v20 = vcombine.low %v920_v39, %v927_v12  ;;  %v1164_v21 = vmul.f32 %v1130_v61, %v1130_v61  ;;  %v1166_v22 = vmul.f32 %v1132_v62, %v1132_v62  ;;  %v1134_v23 = vmax.f32 %v2287_v14, 1e-06 }
 0x160   : > { %v1167_v27 = vmul.f32 %v1133_v18, %v1133_v18  ;;  %v1169_v28 = vmul.f32 %v1135_v6, %v1135_v6  ;;  %v1136_v32 = vmax.f32 %v2289_v16, 1e-06  ;;  %v1137_v45 = vmax.f32 %v2291_v15, 1e-06 }
 0x161   : > { %v935_v46 = vrot.slane %v928_v20, %v2263_v7  ;;  %v1196_v33 = vmul.f32 %v1164_v21, %v1130_v61  ;;  %v1198_v34 = vmul.f32 %v1166_v22, %v1132_v62  ;;  %v1168_v37 = vmul.f32 %v1134_v23, %v1134_v23  ;;  %v2327_v10 = vpop.f32.mrb[48].mxu0  ;;  %v2329_v11 = vpop.f32.mrb[48].mxu1 }
 0x162   : > { %v1199_v29 = vmul.f32 %v1167_v27, %v1133_v18  ;;  %v1201_v38 = vmul.f32 %v1169_v28, %v1135_v6  ;;  %v1170_v2 = vmul.f32 %v1136_v32, %v1136_v32  ;;  %v1171_v14 = vmul.f32 %v1137_v45, %v1137_v45  ;;  %v2331_v41 = vpop.f32.mrb[49].mxu0  ;;  %v2333_v42 = vpop.f32.mrb[49].mxu1 }
 0x163   : > { %v937_v16 = vadd.f32 %v935_v46, %v791_v26  ;;  %v1230_v43 = vadd.f32 %v1229_v1, %v1196_v33  ;;  %v1256_v15 = vadd.f32 %v1255_v13, %v1198_v34  ;;  %v1200_v44 = vmul.f32 %v1168_v37, %v1134_v23  ;;  %v2335_v47 = vpop.f32.mrb[50].mxu0  ;;  %v2337_v50 = vpop.f32.mrb[50].mxu1 }
 0x164   : > { %v1218_v51 = vadd.f32 %v1217_v4, %v1199_v29  ;;  %v1244_v53 = vadd.f32 %v1243_v17, %v1201_v38  ;;  %v1202_v54 = vmul.f32 %v1170_v2, %v1136_v32  ;;  %v1203_v55 = vmul.f32 %v1171_v14, %v1137_v45  ;;  %v2339_v30 = vpop.f32.mrb[51].mxu0  ;;  %v2341_v48 = vpop.f32.mrb[51].mxu1 }
 0x165   : > { %938 = vst.msk [vmem:[#allocation2 + $0x4] sm:$0xf] %vm2266_vm2, %v937_v16  ;;  %v1231_v31 = vadd.f32 %v1230_v43, %v1200_v44  ;;  %v1139_v35 = vmax.f32 %v2293_v19, 1e-06  ;;  %v1138_v39 = vmax.f32 %v2295_v25, 1e-06 }
 0x166   : > { %v1140_v58 = vmax.f32 %v2297_v5, 1e-06  ;;  %v1257_v40 = vadd.f32 %v1256_v15, %v1202_v54  ;;  %v1219_v59 = vadd.f32 %v1218_v51, %v1203_v55  ;;  %v1141_v63 = vmax.f32 %v2301_v56, 1e-06 }
 0x167   : > { %v1143_v0 = vmax.f32 %v2303_v52, 1e-06  ;;  %v1173_v1 = vmul.f32 %v1139_v35, %v1139_v35  ;;  %v1172_v3 = vmul.f32 %v1138_v39, %v1138_v39  ;;  %v1142_v13 = vmax.f32 %v2305_v57, 1e-06 }
 0x168   : > { %v1174_v12 = vmul.f32 %v1140_v58, %v1140_v58  ;;  %v1175_v61 = vmul.f32 %v1141_v63, %v1141_v63  ;;  %v1144_v4 = vmax.f32 %v2307_v36, 1e-06  ;;  %v1145_v19 = vmax.f32 %v2310_v60, 1e-06 }
 0x169   : > { %v1177_v62 = vmul.f32 %v1143_v0, %v1143_v0  ;;  %v1205_v25 = vmul.f32 %v1173_v1, %v1139_v35  ;;  %v1204_v17 = vmul.f32 %v1172_v3, %v1138_v39  ;;  %v1176_v18 = vmul.f32 %v1142_v13, %v1142_v13  ;;  %v2353_v6 = vpop.f32.mrb[52].mxu0  ;;  %v2355_v56 = vpop.f32.mrb[52].mxu1 }
 0x16a   : > { %v1206_v5 = vmul.f32 %v1174_v12, %v1140_v58  ;;  %v1207_v52 = vmul.f32 %v1175_v61, %v1141_v63  ;;  %v1178_v21 = vmul.f32 %v1144_v4, %v1144_v4  ;;  %v1179_v22 = vmul.f32 %v1145_v19, %v1145_v19  ;;  %v2357_v23 = vpop.f32.mrb[53].mxu0  ;;  %v2359_v57 = vpop.f32.mrb[53].mxu1 }
 0x16b   : > { %v1209_v20 = vmul.f32 %v1177_v62, %v1143_v0  ;;  %v1245_v26 = vadd.f32 %v1244_v53, %v1205_v25  ;;  %v1232_v36 = vadd.f32 %v1231_v31, %v1204_v17  ;;  %v1208_v60 = vmul.f32 %v1176_v18, %v1142_v13  ;;  %v2361_v28 = vpop.f32.mrb[54].mxu0  ;;  %v2363_v32 = vpop.f32.mrb[54].mxu1 }
 0x16c   : > { %v1258_v27 = vadd.f32 %v1257_v40, %v1206_v5  ;;  %v1220_v45 = vadd.f32 %v1219_v59, %v1207_v52  ;;  %v1210_v46 = vmul.f32 %v1178_v21, %v1144_v4  ;;  %v1211_v33 = vmul.f32 %v1179_v22, %v1145_v19  ;;  %v2366_v37 = vpop.f32.mrb[55].mxu0  ;;  %v2368_v29 = vpop.f32.mrb[55].mxu1 }
 0x16d   : > { %v1147_v34 = vmax.f32 %v2312_v49, 1e-06  ;;  %v1246_v38 = vadd.f32 %v1245_v26, %v1209_v20  ;;  %v1233_v2 = vadd.f32 %v1232_v36, %v1208_v60  ;;  %v1146_v14 = vmax.f32 %v2314_v8, 1e-06 }
 0x16e   : > { %v1148_v16 = vmax.f32 %v2316_v9, 1e-06  ;;  %v1259_v43 = vadd.f32 %v1258_v27, %v1210_v46  ;;  %v1221_v15 = vadd.f32 %v1220_v45, %v1211_v33  ;;  %v1476_v51 = vmax.f32 %v2327_v10, 1e-06 }
 0x16f   : > { %v1181_v44 = vmul.f32 %v1147_v34, %v1147_v34  ;;  %v1180_v53 = vmul.f32 %v1146_v14, %v1146_v14  ;;  %v1478_v55 = vmax.f32 %v2329_v11, 1e-06  ;;  %v1477_v49 = vmax.f32 %v2331_v41, 1e-06 }
 0x170   : > { %v1182_v54 = vmul.f32 %v1148_v16, %v1148_v16  ;;  %v1222_v31 = vrot.slane %v1221_v15, 4  ;;  %v1510_v39 = vmul.f32 %v1476_v51, %v1476_v51  ;;  %v1479_v58 = vmax.f32 %v2333_v42, 1e-06 }
 0x171   : > { %v1213_v35 = vmul.f32 %v1181_v44, %v1147_v34  ;;  %v1212_v40 = vmul.f32 %v1180_v53, %v1146_v14  ;;  %v1512_v59 = vmul.f32 %v1478_v55, %v1478_v55  ;;  %v1511_v9 = vmul.f32 %v1477_v49, %v1477_v49  ;;  %v2376_v63 = vpop.f32.mrb[56].mxu0  ;;  %v2378_v0 = vpop.f32.mrb[56].mxu1 }
 0x172   : > { %v1214_v8 = vmul.f32 %v1182_v54, %v1148_v16  ;;  %v1223_v10 = vadd.f32 %v1222_v31, %v1221_v15  ;;  %v1542_v3 = vmul.f32 %v1510_v39, %v1476_v51  ;;  %v1513_v12 = vmul.f32 %v1479_v58, %v1479_v58  ;;  %v2380_v11 = vpop.f32.mrb[57].mxu0  ;;  %v2382_v41 = vpop.f32.mrb[57].mxu1 }
 0x173   : > { %v1247_v1 = vadd.f32 %v1246_v38, %v1213_v35  ;;  %v1234_v13 = vadd.f32 %v1233_v2, %v1212_v40  ;;  %v1544_v62 = vmul.f32 %v1512_v59, %v1478_v55  ;;  %v1543_v42 = vmul.f32 %v1511_v9, %v1477_v49  ;;  %v2384_v4 = vpop.f32.mrb[58].mxu0  ;;  %v2386_v19 = vpop.f32.mrb[58].mxu1 }
 0x174   : > { %v1260_v61 = vadd.f32 %v1259_v43, %v1214_v8  ;;  %v1224_v25 = vrot.slane %v1223_v10, 2  ;;  %v1545_v5 = vmul.f32 %v1513_v12, %v1479_v58  ;;  %v1480_v18 = vmax.f32 %v2335_v47, 1e-06  ;;  %v2389_v52 = vpop.f32.mrb[59].mxu0  ;;  %v2391_v20 = vpop.f32.mrb[59].mxu1 }
 0x175   : > { %v1248_v17 = vrot.slane %v1247_v1, 4  ;;  %v1235_v21 = vrot.slane %v1234_v13, 4  ;;  %v1482_v26 = vmax.f32 %v2337_v50, 1e-06  ;;  %v1481_v36 = vmax.f32 %v2339_v30, 1e-06 }
 0x176   : > { %v1261_v22 = vrot.slane %v1260_v61, 4  ;;  %v1225_v27 = vadd.f32 %v1224_v25, %v1223_v10  ;;  %v1514_v45 = vmul.f32 %v1480_v18, %v1480_v18  ;;  %v1483_v46 = vmax.f32 %v2341_v48, 1e-06 }
 0x177   : > { %v1249_v60 = vadd.f32 %v1248_v17, %v1247_v1  ;;  %v1236_v33 = vadd.f32 %v1235_v21, %v1234_v13  ;;  %v1516_v38 = vmul.f32 %v1482_v26, %v1482_v26  ;;  %v1515_v2 = vmul.f32 %v1481_v36, %v1481_v36 }
 0x178   : > { %v1262_v34 = vadd.f32 %v1261_v22, %v1260_v61  ;;  %v1226_v47 = vrot.slane %v1225_v27, 1  ;;  %v1546_v16 = vmul.f32 %v1514_v45, %v1480_v18  ;;  %v1517_v43 = vmul.f32 %v1483_v46, %v1483_v46 }
 0x179   : > { %v1250_v14 = vrot.slane %v1249_v60, 2  ;;  %v1237_v15 = vrot.slane %v1236_v33, 2  ;;  %v1548_v51 = vmul.f32 %v1516_v38, %v1482_v26  ;;  %v1547_v53 = vmul.f32 %v1515_v2, %v1481_v36  ;;  %v2396_v50 = vpop.f32.mrb[60].mxu0  ;;  %v2398_v30 = vpop.f32.mrb[60].mxu1 }
 0x17a   : > { %v1263_v44 = vrot.slane %v1262_v34, 2  ;;  %v1227_v54 = vadd.f32 %v1226_v47, %v1225_v27  ;;  %v1574_v49 = vadd.f32 %v1546_v16, %v1542_v3  ;;  %v1549_v48 = vmul.f32 %v1517_v43, %v1483_v46  ;;  %v2400_v31 = vpop.f32.mrb[61].mxu0  ;;  %v2402_v35 = vpop.f32.mrb[61].mxu1 }
 0x17b   : > { %v1251_v55 = vadd.f32 %v1250_v14, %v1249_v60  ;;  %v1238_v39 = vadd.f32 %v1237_v15, %v1236_v33  ;;  %v1600_v40 = vadd.f32 %v1548_v51, %v1544_v62  ;;  %v1587_v8 = vadd.f32 %v1547_v53, %v1543_v42  ;;  %v2404_v59 = vpop.f32.mrb[62].mxu0  ;;  %v2406_v9 = vpop.f32.mrb[62].mxu1 }
 0x17c   : > { %v1264_v58 = vadd.f32 %v1263_v44, %v1262_v34  ;;  %v1613_v1 = vadd.f32 %v1549_v48, %v1545_v5  ;;  %v1484_v12 = vmax.f32 %v2353_v6, 1e-06  ;;  %v1486_v13 = vmax.f32 %v2355_v56, 1e-06  ;;  %v2410_v3 = vpop.f32.mrb[63].mxu0  ;;  %v2415_v26 = vpop.f32.mrb[63].mxu1 }
 0x17d   : > { %v1252_v10 = vrot.slane %v1251_v55, 1  ;;  %v1239_v61 = vrot.slane %v1238_v39, 1  ;;  %v1485_v17 = vmax.f32 %v2357_v23, 1e-06  ;;  %v1487_v18 = vmax.f32 %v2359_v57, 1e-06 }
 0x17e   : > { %v1265_v25 = vrot.slane %v1264_v58, 1  ;;  %v1518_v42 = vmul.f32 %v1484_v12, %v1484_v12  ;;  %v1520_v21 = vmul.f32 %v1486_v13, %v1486_v13  ;;  %v1488_v22 = vmax.f32 %v2361_v28, 1e-06 }
 0x17f   : > { %v1253_v62 = vadd.f32 %v1252_v10, %v1251_v55  ;;  %v1240_v5 = vadd.f32 %v1239_v61, %v1238_v39  ;;  %v1519_v6 = vmul.f32 %v1485_v17, %v1485_v17  ;;  %v1521_v27 = vmul.f32 %v1487_v18, %v1487_v18  ;;  %v1150_v39 = vld [vmem:[#allocation2 + $0x8] sm:$0xf] }
 0x180   : > { %v1266_v36 = vadd.f32 %v1265_v25, %v1264_v58  ;;  %v1550_v56 = vmul.f32 %v1518_v42, %v1484_v12  ;;  %v1552_v60 = vmul.f32 %v1520_v21, %v1486_v13  ;;  %v1522_v45 = vmul.f32 %v1488_v22, %v1488_v22 }
 0x181   : > { %v1490_v46 = vmax.f32 %v2363_v32, 1e-06  ;;  %v1271_v33 = vcombine.low %v1227_v54, %v1240_v5  ;;  %v1551_v34 = vmul.f32 %v1519_v6, %v1485_v17  ;;  %v1553_v57 = vmul.f32 %v1521_v27, %v1487_v18 }
 0x182   : > { %v1272_v23 = vcombine.low %v1253_v62, %v1266_v36  ;;  %v1575_v38 = vadd.f32 %v1574_v49, %v1550_v56  ;;  %v1601_v2 = vadd.f32 %v1600_v40, %v1552_v60  ;;  %v1554_v47 = vmul.f32 %v1522_v45, %v1488_v22 }
 0x183   : > { %v1524_v14 = vmul.f32 %v1490_v46, %v1490_v46  ;;  %v1279_v28 = vrot.slane %v1271_v33, %v2263_v7  ;;  %v1588_v43 = vadd.f32 %v1587_v8, %v1551_v34  ;;  %v1614_v15 = vadd.f32 %v1613_v1, %v1553_v57 }
 0x184   : > { %v1286_v16 = vrot.slane %v1272_v23, %v2263_v7  ;;  %v1576_v44 = vadd.f32 %v1575_v38, %v1554_v47  ;;  %v1489_v53 = vmax.f32 %v2366_v37, 1e-06  ;;  %v1491_v32 = vmax.f32 %v2368_v29, 1e-06 }
 0x185   : > { %v1556_v51 = vmul.f32 %v1524_v14, %v1490_v46  ;;  %v1492_v55 = vmax.f32 %v2376_v63, 1e-06  ;;  %v1494_v49 = vmax.f32 %v2378_v0, 1e-06  ;;  %v1493_v48 = vmax.f32 %v2380_v11, 1e-06 }
 0x186   : > { %v1287_v54 = vcombine.low %v1279_v28, %v1286_v16  ;;  %v1523_v40 = vmul.f32 %v1489_v53, %v1489_v53  ;;  %v1525_v10 = vmul.f32 %v1491_v32, %v1491_v32  ;;  %v1495_v8 = vmax.f32 %v2382_v41, 1e-06 }
 0x187   : > { %v1602_v58 = vadd.f32 %v1601_v2, %v1556_v51  ;;  %v1526_v12 = vmul.f32 %v1492_v55, %v1492_v55  ;;  %v1528_v13 = vmul.f32 %v1494_v49, %v1494_v49  ;;  %v1527_v37 = vmul.f32 %v1493_v48, %v1493_v48 }
 0x188   : > { %v1294_v1 = vrot.slane %v1287_v54, %v2263_v7  ;;  %v1555_v61 = vmul.f32 %v1523_v40, %v1489_v53  ;;  %v1557_v29 = vmul.f32 %v1525_v10, %v1491_v32  ;;  %v1529_v25 = vmul.f32 %v1495_v8, %v1495_v8 }
 0x189   : > { %v1496_v63 = vmax.f32 %v2384_v4, 1e-06  ;;  %v1558_v0 = vmul.f32 %v1526_v12, %v1492_v55  ;;  %v1560_v18 = vmul.f32 %v1528_v13, %v1494_v49  ;;  %v1559_v11 = vmul.f32 %v1527_v37, %v1493_v48 }
 0x18a   : > { %v1296_v17 = vadd.f32 %v1294_v1, %v1150_v39  ;;  %v1589_v62 = vadd.f32 %v1588_v43, %v1555_v61  ;;  %v1615_v42 = vadd.f32 %v1614_v15, %v1557_v29  ;;  %v1561_v21 = vmul.f32 %v1529_v25, %v1495_v8 }
 0x18b   : > { %v1530_v22 = vmul.f32 %v1496_v63, %v1496_v63  ;;  %v1577_v41 = vadd.f32 %v1576_v44, %v1558_v0  ;;  %v1603_v5 = vadd.f32 %v1602_v58, %v1560_v18  ;;  %v1498_v36 = vmax.f32 %v2386_v19, 1e-06 }
 0x18c   : > { %1297 = vst.msk [vmem:[#allocation2 + $0x8] sm:$0xf] %vm2266_vm2, %v1296_v17  ;;  %v1497_v6 = vmax.f32 %v2389_v52, 1e-06  ;;  %v1590_v27 = vadd.f32 %v1589_v62, %v1559_v11  ;;  %v1616_v56 = vadd.f32 %v1615_v42, %v1561_v21  ;;  %v1499_v60 = vmax.f32 %v2391_v20, 1e-06 }
 0x18d   : > { %v1562_v4 = vmul.f32 %v1530_v22, %v1496_v63  ;;  %v1532_v45 = vmul.f32 %v1498_v36, %v1498_v36  ;;  %v1500_v33 = vmax.f32 %v2396_v50, 1e-06  ;;  %v1502_v23 = vmax.f32 %v2398_v30, 1e-06 }
 0x18e   : > { %v1531_v46 = vmul.f32 %v1497_v6, %v1497_v6  ;;  %v1533_v57 = vmul.f32 %v1499_v60, %v1499_v60  ;;  %v1501_v38 = vmax.f32 %v2400_v31, 1e-06  ;;  %v1503_v2 = vmax.f32 %v2402_v35, 1e-06 }
 0x18f   : > { %v1578_v34 = vadd.f32 %v1577_v41, %v1562_v4  ;;  %v1564_v19 = vmul.f32 %v1532_v45, %v1498_v36  ;;  %v1534_v52 = vmul.f32 %v1500_v33, %v1500_v33  ;;  %v1536_v14 = vmul.f32 %v1502_v23, %v1502_v23 }
 0x190   : > { %v1563_v47 = vmul.f32 %v1531_v46, %v1497_v6  ;;  %v1565_v28 = vmul.f32 %v1533_v57, %v1499_v60  ;;  %v1535_v16 = vmul.f32 %v1501_v38, %v1501_v38  ;;  %v1537_v43 = vmul.f32 %v1503_v2, %v1503_v2 }
 0x191   : > { %v1504_v20 = vmax.f32 %v2404_v59, 1e-06  ;;  %v1604_v15 = vadd.f32 %v1603_v5, %v1564_v19  ;;  %v1566_v50 = vmul.f32 %v1534_v52, %v1500_v33  ;;  %v1568_v51 = vmul.f32 %v1536_v14, %v1502_v23 }
 0x192   : > { %v1591_v44 = vadd.f32 %v1590_v27, %v1563_v47  ;;  %v1617_v30 = vadd.f32 %v1616_v56, %v1565_v28  ;;  %v1567_v53 = vmul.f32 %v1535_v16, %v1501_v38  ;;  %v1569_v32 = vmul.f32 %v1537_v43, %v1503_v2  ;;  %v1509_v47 = vld [vmem:[#allocation2 + $0xc] sm:$0xf]  ;;  %v1661_v28 = vld [vmem:[#allocation2] sm:$0xff] (!%p1825_p1) }
 0x193   : > { %v1538_v54 = vmul.f32 %v1504_v20, %v1504_v20  ;;  %v1579_v31 = vadd.f32 %v1578_v34, %v1566_v50  ;;  %v1605_v55 = vadd.f32 %v1604_v15, %v1568_v51  ;;  %v1506_v35 = vmax.f32 %v2406_v9, 1e-06 }
 0x194   : > { %v1505_v49 = vmax.f32 %v2410_v3, 1e-06  ;;  %v1592_v48 = vadd.f32 %v1591_v44, %v1567_v53  ;;  %v1618_v39 = vadd.f32 %v1617_v30, %v1569_v32  ;;  %v1507_v40 = vmax.f32 %v2415_v26, 1e-06 }
 0x195   : > { %v1570_v58 = vmul.f32 %v1538_v54, %v1504_v20  ;;  %v1540_v59 = vmul.f32 %v1506_v35, %v1506_v35  ;;  %v1663_v43 = vmul.f32 (!%p1825_p1), 0.00390625, %v1661_v28 }
 0x196   : > { %v1539_v10 = vmul.f32 %v1505_v49, %v1505_v49  ;;  %v1541_v1 = vmul.f32 %v1507_v40, %v1507_v40 }
 0x197   : > { %v1580_v8 = vadd.f32 %v1579_v31, %v1570_v58  ;;  %v1572_v12 = vmul.f32 %v1540_v59, %v1506_v35  ;;  %1915 = vlog2.f32 (!%p1825_p1), %v1663_v43 }
 0x198   : > { %v1571_v13 = vmul.f32 %v1539_v10, %v1505_v49  ;;  %v1573_v61 = vmul.f32 %v1541_v1, %v1507_v40 }
 0x199   : > { %v1581_v37 = vrot.slane %v1580_v8, 4  ;;  %v1606_v29 = vadd.f32 %v1605_v55, %v1572_v12 }
 0x19a   : > { %v1593_v25 = vadd.f32 %v1592_v48, %v1571_v13  ;;  %v1619_v17 = vadd.f32 %v1618_v39, %v1573_v61 }
 0x19b   : > { %v1582_v63 = vadd.f32 %v1581_v37, %v1580_v8  ;;  %v1607_v9 = vrot.slane %v1606_v29, 4 }
 0x19c   : > { %v1594_v0 = vrot.slane %v1593_v25, 4  ;;  %v1620_v18 = vrot.slane %v1619_v17, 4 }
 0x19d   : > { %v1583_v3 = vrot.slane %v1582_v63, 2  ;;  %v1608_v11 = vadd.f32 %v1607_v9, %v1606_v29 }
 0x19e   : > { %v1595_v62 = vadd.f32 %v1594_v0, %v1593_v25  ;;  %v1621_v26 = vadd.f32 %v1620_v18, %v1619_v17 }
 0x19f   : > { %v1584_v42 = vadd.f32 %v1583_v3, %v1582_v63  ;;  %v1609_v21 = vrot.slane %v1608_v11, 2 }
 0x1a0   : > { %v1596_v22 = vrot.slane %v1595_v62, 2  ;;  %v1622_v5 = vrot.slane %v1621_v26, 2 }
 0x1a1   : > { %v1585_v41 = vrot.slane %v1584_v42, 1  ;;  %v1610_v36 = vadd.f32 %v1609_v21, %v1608_v11  ;;  %v1916_v15 = vpop.eup (!%p1825_p1), %1915 }
 0x1a2   : > { %v1597_v6 = vadd.f32 %v1596_v22, %v1595_v62  ;;  %v1623_v27 = vadd.f32 %v1622_v5, %v1621_v26  ;;  %v1666_v50 = vmul.f32 (!%p1825_p1), 0.6931472, %v1916_v15 }
 0x1a3   : > { %v1586_v56 = vadd.f32 %v1585_v41, %v1584_v42  ;;  %v1611_v4 = vrot.slane %v1610_v36, 1 }
 0x1a4   : > { %v1598_v60 = vrot.slane %v1597_v6, 1  ;;  %v1624_v45 = vrot.slane %v1623_v27, 1 }
 0x1a5   : > { %v1612_v46 = vadd.f32 %v1611_v4, %v1610_v36 }
 0x1a6   : > { %v1599_v33 = vadd.f32 %v1598_v60, %v1597_v6  ;;  %v1625_v23 = vadd.f32 %v1624_v45, %v1623_v27 }
 0x1a8   : > { %v1630_v34 = vcombine.low %v1586_v56, %v1599_v33  ;;  %v1631_v57 = vcombine.low %v1612_v46, %v1625_v23 }
 0x1aa   : > { %v1638_v38 = vrot.slane %v1630_v34, %v2263_v7  ;;  %v1645_v2 = vrot.slane %v1631_v57, %v2263_v7 }
 0x1ac   : > { %v1646_v19 = vcombine.low %v1638_v38, %v1645_v2  ;;  %1660 = sbr.rel (%p1825_p1) target bundleno = 473 (0x1d9), region = 36 }
 0x1ae   : > { %v1653_v52 = vrot.slane %v1646_v19, %v2263_v7  ;;  %v1669_v7 = vmul.f32 (!%p1825_p1), 0.33333334, %v1666_v50 }
 0x1b0   : > { %v1655_v14 = vadd.f32 %v1653_v52, %v1509_v47  ;;  %v1671_v53 = vmul.f32 (!%p1825_p1), 1.442695, %v1669_v7 }
 0x1b2   : > { %1656 = vst.msk [vmem:[#allocation2 + $0xc] sm:$0xf] %vm2266_vm2, %v1655_v14 }
 0x1b9   : > { %v1662_v16 = vld [vmem:[#allocation2 + $0x8] sm:$0xff] }
 0x1ba   : > { %v1664_v20 = vmul.f32 0.00390625, %v1662_v16 }
 0x1bc   : > { %1917 = vlog2.f32 %v1664_v20 }
 0x1bd   : > { %1919 = vpow2.f32 %v1671_v53 }
 0x1c6   : > { %v1918_v44 = vpop.eup %1917 }
 0x1c7   : > { %v1668_v51 = vmul.f32 0.6931472, %v1918_v44  ;;  %v1920_v32 = vpop.eup %1919 }
 0x1c8   : > { %1675 = vst [vmem:[%s2119_s8] sm:$0xff] %v1920_v32 }
 0x1c9   : > { %v1670_v30 = vmul.f32 0.33333334, %v1668_v51 }
 0x1cb   : > { %v1673_v24 = vmul.f32 1.442695, %v1670_v30 }
 0x1cd   : > { %1921 = vpow2.f32 %v1673_v24 }
 0x1d7   : > { %v1922_v54 = vpop.eup %1921 }
 0x1d8   : > { %1676 = vst [vmem:[%s2119_s8 + $0x8] sm:$0xff] %v1922_v54 }
 0x1d9 PF: > { %s1831_s12 = sshll.u32 %s2005_s13, 8  ;;  %s1692_s6 = sshll.u32 %s2119_s8, 4  ;;  %s1693_s6 = int_to_ptr.vmem [resolvable:$true] %s1692_s6 }
 0x1da   : > { %s2453_s5 = scalar_lea.hbm %s2505_s2, %s1831_s12  ;;  %s1678_s7 = scalar_lea.sflag [#allocation4], %s157_s26 }
 0x1db   : > { %s1923_s17 = scalar_lea.vmem %s1693_s6, 256  ;;  %s2023_s18 = smov [#allocation3]  }
 0x1dc   : > { %p1924_p2 = scmp.ne.s32.totalorder %s1693_s6, %s1923_s17  ;;  %s1927_s23 = sshll.u32 %s2023_s18, 4  ;;  %s1928_s23 = int_to_ptr.vmem [resolvable:$false] %s1927_s23 }
 0x1dd   : > { %s1929_s24 = scalar_lea.vmem %s1928_s23, 512  ;;  %p1930_p6 = scmp.lt.s32.totalorder %s1693_s6, %s1928_s23 }
 0x1de   : > { %p1925_p4 = pnand %p1924_p2, %p2088_p3  ;;  %p1931_p7 = scmp.lt.s32.totalorder %s1929_s24, %s1923_s17 }
 0x1e0   : > { %p1926_p5 = pneg %p1925_p4  ;;  %p1932_p8 = por %p1931_p7, %p1930_p6 }
 0x1e2   : > { %p1933_p10 = pnand %p1932_p8, %p1926_p5 }
 0x1e4   : > { %1936 = shalt.err (!%p1933_p10)
}
 0x1e5   : > { %s1937_s13 = scalar_lea.hbm %s2453_s5, 256  ;;  %s1941_s27 = scalar_lea.hbm %s2505_s2, 512 }
 0x1e6   : > { %p1938_p11 = scmp.ne.s32.totalorder %s2453_s5, %s1937_s13  ;;  %p1942_p0 = scmp.lt.u32.totalorder %s2453_s5, %s2505_s2 }
 0x1e7   : > { %p1943_p1 = scmp.lt.u32.totalorder %s1941_s27, %s1937_s13  ;;  %p1945_p4 = scmp.lt.u32.totalorder %s1937_s13, %s2453_s5 }
 0x1e8   : > { %p1939_p12 = pnand %p1938_p11, %p2088_p3 }
 0x1e9   : > { %p1944_p2 = por %p1943_p1, %p1942_p0 }
 0x1ea   : > { %p1940_p13 = pneg %p1939_p12 }
 0x1eb   : > { %p1946_p5 = por %p1945_p4, %p1944_p2 }
 0x1ed   : > { %p1947_p6 = pnand %p1946_p5, %p1940_p13 }
 0x1ef   : > { %1950 = shalt.err (!%p1947_p6)
}
 0x1f0   : > { %1832 = dma.vmem_to_hbm [thread:$0]  (%p2088_p3), %s1693_s6, 256, %s2453_s5, %s1678_s7  }
 0x1f1 PF: > { %p1838_p7 = scmp.ge.s32.totalorder %s2017_s16, 2  ;;  %s1704_s30 = sand.u32 1, %s1989_s9  }
 0x1f2   : > { %s1705_s12 = scalar_lea.sflag [#allocation4], %s1704_s30 }
 0x1f3   : > { %p1835_p8 = pnand %p1838_p7, %p2098_p9 }
 0x1f5   : > { %1984 = dma.done.wait (!%p1835_p8), %s1705_s12, 256  }
 0x1f6   : > { %1986 = vsyncadd (!%p1835_p8), %s1705_s12, 4294967040  ;;  %s15_s16 = sadd.s32 1, %s2017_s16   ;;  %s2510_s9 = smov %s1993_s10 }
 0x1f7   : > { %p12_p10 = scmp.ge.s32.totalorder %s15_s16, 10   ;;  %s2511_s10 = smov %s1997_s11 }
 0x1f8   : > { %s2512_s11 = smov %s2106_s25  ;;  %s2513_s12 = smov %s2009_s14 }
 0x1f9   : > { %s2514_s13 = smov %s2013_s15  ;;  %s2515_s14 = smov %s2518_s19 }
 0x1fa   : > { %s2516_s15 = smov %s2522_s20  ;;  %14 = sbr.rel (!%p12_p10) target bundleno = 5 (0x5), region = 77 }
 0x201   :  { %1710 = vsyncpa [#allocation4], 1 }
 0x202   :  { %1712 = vsyncpa [#allocation4 + $0x1], 1 }

</bundles_post_ra>
